<compile_context>
chip_gen: v5e
topology: v5e:2x2
jax: 0.10.0
libtpu: 0.0.40
codegen_flags: <defaults>
</compile_context>

<pallas_src>
import functools

import jax
import jax.numpy as jnp
from jax import lax
from jax.experimental import pallas as pl
from jax.experimental.pallas import tpu as pltpu


_LANE = 128
_SUBLANE = 8


def _round_up(n, m):
    return ((n + m - 1) // m) * m


# ----------------------------------------------------------------------------
# Fused Pallas kernel: conv1 (grouped shared-weight matmuls) -> relu -> conv2
# -> relu -> conv3 -> flatten (identity) -> relu -> fc_1.
# ----------------------------------------------------------------------------
def _cnn2_fused_kernel(xp_ref, w1_ref, b1_ref, t2_ref, b2_ref, t3_ref, b3_ref,
                       tfc_ref, bfc_ref, o_ref, *, n_groups, grp_in):
    # ---- conv1: one small bf16 weight shared by all `n_groups` row-groups.
    w1 = w1_ref[...]
    parts = []
    for g in range(n_groups):
        xg = xp_ref[:, g * grp_in:(g + 1) * grp_in].astype(jnp.bfloat16)
        parts.append(jnp.dot(xg, w1, preferred_element_type=jnp.float32))
    y = jnp.concatenate(parts, axis=-1) + b1_ref[...]
    y = jnp.maximum(y, 0.0)
    # ---- conv2 (dense unfolded matrix over the group-padded conv1 layout).
    y = jnp.dot(y.astype(jnp.bfloat16), t2_ref[...],
                preferred_element_type=jnp.float32) + b2_ref[...]
    y = jnp.maximum(y, 0.0)
    # ---- conv3; torch.reshape(y, (B, -1)) is the identity in NCHW-flat layout.
    y = jnp.dot(y.astype(jnp.bfloat16), t3_ref[...],
                preferred_element_type=jnp.float32) + b3_ref[...]
    y = jnp.maximum(y, 0.0)
    # ---- fc_1 (no ReLU).
    o_ref[...] = jnp.dot(y.astype(jnp.bfloat16), tfc_ref[...],
                         preferred_element_type=jnp.float32) + bfc_ref[...]


# ----------------------------------------------------------------------------
# One-time parameter packing (init-time, off the runtime path).
# ----------------------------------------------------------------------------
def _conv_unfold_matrix(w_oihw, in_shape, stride, pad):
    """Dense T with flatNCHW(conv(x)) == flatNCHW(x) @ T (bias excluded)."""
    cin, h, w = in_shape
    n = cin * h * w
    basis = jnp.eye(n, dtype=jnp.float32).reshape(n, cin, h, w)
    out = lax.conv_general_dilated(
        basis, w_oihw.astype(jnp.float32), (stride, stride),
        [(pad, pad), (pad, pad)], dimension_numbers=("NCHW", "OIHW", "NCHW"))
    cout, ho, wo = out.shape[1], out.shape[2], out.shape[3]
    return out.reshape(n, cout * ho * wo), (cout, ho, wo)


def _pad2(a, rows, cols):
    r, c = a.shape
    return jnp.pad(a, ((0, rows - r), (0, cols - c)))


def pack_cnn2_params(params, in_shape):
    """Pack conv1 as a shared per-row-group block weight, conv2/conv3 as dense
    unfolded matrices, fold flatten + fc transpose, pad all K/N dims to 128
    multiples, and cast matmul weights to bf16 (biases stay f32)."""
    cin, h, w = in_shape
    c1 = params["conv1_w"].shape[0]
    ho1, wo1 = (h - 3) // 3 + 1, (w - 3) // 3 + 1
    patch_k = cin * 9
    assert patch_k <= _LANE  # TODO(synk): widen the per-patch slot for cin > 14.
    grp_out = wo1 * c1
    grp_out_p = _round_up(grp_out, _LANE)

    # conv1 weight in (cin,kh,kw) -> cout flat form, block-diagonal over the
    # wo1 patches of one output row (the same block weight serves every row).
    w1flat = params["conv1_w"].transpose(1, 2, 3, 0).reshape(patch_k, c1)
    w1grp = jnp.zeros((wo1 * _LANE, grp_out_p), jnp.float32)
    for j in range(wo1):
        w1grp = w1grp.at[j * _LANE:j * _LANE + patch_k,
                         j * c1:(j + 1) * c1].set(w1flat)
    b1_row = jnp.concatenate(
        [jnp.tile(params["conv1_b"], wo1),
         jnp.zeros((grp_out_p - grp_out,), jnp.float32)])
    b1 = jnp.tile(b1_row, ho1)[None, :]                       # (1, ho1*grp_out_p)

    # conv2 unfold over the NCHW-flat conv1 output, then re-based onto the
    # kernel's group-padded (oh, ow, cout) layout via a 0/1 scatter matrix.
    t2_nchw, s2 = _conv_unfold_matrix(params["conv2_w"], (c1, ho1, wo1), 2, 2)
    n1 = ho1 * grp_out_p
    q = jnp.arange(n1)
    g, r = q // grp_out_p, q % grp_out_p
    ow, cc = r // c1, r % c1
    nchw_idx = cc * (ho1 * wo1) + g * wo1 + ow
    scat = jnp.where(
        (r < grp_out)[:, None],
        (jnp.arange(c1 * ho1 * wo1)[None, :] == nchw_idx[:, None])
        .astype(jnp.float32), 0.0)
    t2 = scat @ t2_nchw
    b2 = jnp.repeat(params["conv2_b"], s2[1] * s2[2])

    t3, s3 = _conv_unfold_matrix(params["conv3_w"], s2, 2, 1)
    b3 = jnp.repeat(params["conv3_b"], s3[1] * s3[2])

    tfc = params["fc_w"].T                                    # (fc_in, feature_dim)
    bfc = params["fc_b"]

    n2p = _round_up(t2.shape[1], _LANE)
    n3p = _round_up(t3.shape[1], _LANE)
    nfp = _round_up(tfc.shape[1], _LANE)
    return {
        "w1": w1grp.astype(jnp.bfloat16),
        "b1": b1,
        "t2": _pad2(t2, n1, n2p).astype(jnp.bfloat16),
        "b2": _pad2(b2[None, :], 1, n2p),
        "t3": _pad2(t3, n2p, n3p).astype(jnp.bfloat16),
        "b3": _pad2(b3[None, :], 1, n3p),
        "tfc": _pad2(tfc, n3p, nfp).astype(jnp.bfloat16),
        "bfc": _pad2(bfc[None, :], 1, nfp),
    }


# ----------------------------------------------------------------------------
# Forward pass: wrapper-side im2col (pure reshape for stride==kernel), one
# pallas_call with an M-grid and resident weights, slice the padded result.
# ----------------------------------------------------------------------------
def cnn2_forward(packed, x_nchw, *, feature_dim, tile_m=128):
    B, C, H, W = x_nchw.shape
    ho, wo = (H - 3) // 3 + 1, (W - 3) // 3 + 1
    patch_k = C * 9

    # im2col for conv1: stride == kernel_size => non-overlapping patches, so
    # this is layout plumbing only.  One lane-aligned 128-wide slot per patch.
    x = x_nchw.astype(jnp.float32)
    xp = x[:, :, :ho * 3, :wo * 3].reshape(B, C, ho, 3, wo, 3)
    xp = xp.transpose(0, 2, 4, 1, 3, 5).reshape(B, ho * wo, patch_k)
    xp = jnp.pad(xp, ((0, 0), (0, 0), (0, _LANE - patch_k)))
    xp = xp.reshape(B, ho * wo * _LANE)

    tm = tile_m if B >= tile_m else _round_up(B, _SUBLANE)
    m_pad = _round_up(B, tm)
    xp = jnp.pad(xp, ((0, m_pad - B), (0, 0)))

    nfp = packed["bfc"].shape[1]
    kernel = functools.partial(_cnn2_fused_kernel, n_groups=ho,
                               grp_in=wo * _LANE)

    out = pl.pallas_call(
        kernel,
        out_shape=jax.ShapeDtypeStruct((m_pad, nfp), jnp.float32),
        grid=(m_pad // tm,),
        in_specs=[
            pl.BlockSpec((tm, xp.shape[1]), lambda i: (i, 0)),
            # Weights/biases: constant index_map -> DMA'd once, held resident.
            pl.BlockSpec(packed["w1"].shape, lambda i: (0, 0)),
            pl.BlockSpec(packed["b1"].shape, lambda i: (0, 0)),
            pl.BlockSpec(packed["t2"].shape, lambda i: (0, 0)),
            pl.BlockSpec(packed["b2"].shape, lambda i: (0, 0)),
            pl.BlockSpec(packed["t3"].shape, lambda i: (0, 0)),
            pl.BlockSpec(packed["b3"].shape, lambda i: (0, 0)),
            pl.BlockSpec(packed["tfc"].shape, lambda i: (0, 0)),
            pl.BlockSpec(packed["bfc"].shape, lambda i: (0, 0)),
        ],
        out_specs=pl.BlockSpec((tm, nfp), lambda i: (i, 0)),
        compiler_params=pltpu.CompilerParams(
            dimension_semantics=("parallel",)),
    )(xp, packed["w1"], packed["b1"], packed["t2"], packed["b2"],
      packed["t3"], packed["b3"], packed["tfc"], packed["bfc"])
    return out[:B, :feature_dim]


# ----------------------------------------------------------------------------
# Parameter init (PyTorch-like layout) and pure-JAX f32 reference for checking.
# ----------------------------------------------------------------------------
def _conv_out(size, k, s, p):
    return (size + 2 * p - k) // s + 1


def init_cnn2_params(key, in_channels, *, out_channels=4, feature_dim=64, fc_in=256):
    def conv_init(k, cout, cin, ksz):
        kw, kb = jax.random.split(k)
        fan_in = cin * ksz * ksz
        w = jax.random.normal(kw, (cout, cin, ksz, ksz), jnp.float32) * (
            2.0 / fan_in) ** 0.5
        b = 0.1 * jax.random.normal(kb, (cout,), jnp.float32)
        return w, b

    k1, k2, k3, k4, k5, k6 = jax.random.split(key, 6)
    p = {}
    p["conv1_w"], p["conv1_b"] = conv_init(k1, 16, in_channels, 3)
    p["conv2_w"], p["conv2_b"] = conv_init(k2, 32, 16, 5)
    p["conv3_w"], p["conv3_b"] = conv_init(k3, 64, 32, 3)
    # conv4 is initialized (per __init__) but never used in forward().
    p["conv4_w"], p["conv4_b"] = conv_init(k4, out_channels, 64, 3)
    # TODO(synk): the reference __init__ sets fc_1 in_features = out_channels*3*3
    # = 36, inconsistent with its own forward() (conv3 emits 64 channels); fc_1
    # is sized here from the actual flattened width so forward runs.
    p["fc_w"] = jax.random.normal(k5, (feature_dim, fc_in), jnp.float32) * (
        1.0 / fc_in) ** 0.5
    p["fc_b"] = 0.1 * jax.random.normal(k6, (feature_dim,), jnp.float32)
    return p


def cnn2_reference(params, x_nchw):
    def conv(x, w, b, stride, pad):
        y = lax.conv_general_dilated(
            x, w, (stride, stride), [(pad, pad), (pad, pad)],
            dimension_numbers=("NCHW", "OIHW", "NCHW"))
        return y + b[None, :, None, None]

    y = conv(x_nchw, params["conv1_w"], params["conv1_b"], 3, 0)
    y = jax.nn.relu(y)
    y = conv(y, params["conv2_w"], params["conv2_b"], 2, 2)
    y = jax.nn.relu(y)
    y = conv(y, params["conv3_w"], params["conv3_b"], 2, 1)
    y = y.reshape(x_nchw.shape[0], -1)
    y = jax.nn.relu(y)
    return y @ params["fc_w"].T + params["fc_b"]


if __name__ == "__main__":
    B, Cin, H, W = 2, 4, 16, 16
    feature_dim = 64

    # Spatial sizes through the three convs used by forward().
    h1 = _conv_out(H, 3, 3, 0)   # 5
    h2 = _conv_out(h1, 5, 2, 2)  # 3
    h3 = _conv_out(h2, 3, 2, 1)  # 2
    fc_in = 64 * h3 * h3         # 256

    key = jax.random.PRNGKey(0)
    kp, kx = jax.random.split(key)
    params = init_cnn2_params(kp, Cin, out_channels=4, feature_dim=feature_dim,
                              fc_in=fc_in)
    x = jax.random.normal(kx, (B, Cin, H, W), jnp.float32)

    # One-time packing (init-time), then a jitted single-kernel forward.
    packed = jax.tree_util.tree_map(jax.block_until_ready,
                                    pack_cnn2_params(params, (Cin, H, W)))
    fwd = jax.jit(functools.partial(cnn2_forward, feature_dim=feature_dim))

    out = jax.block_until_ready(fwd(packed, x))
    assert out.shape == (B, feature_dim), out.shape

    # bf16 weights/activations => compare against the f32 reference with a
    # relaxed (but still bug-catching) tolerance.
    ref = jax.block_until_ready(cnn2_reference(params, x))
    rel = jnp.linalg.norm(out - ref) / jnp.linalg.norm(ref)
    assert rel < 5e-2, float(rel)
    assert jnp.allclose(out, ref, atol=1e-1, rtol=1e-1), (
        float(jnp.max(jnp.abs(out - ref))))

    print("KERNEL_OK")
</pallas_src>

<mosaic_0001>
module attributes {stable_mosaic.version = 11 : i64} {
  func.func @_cnn2_fused_kernel(%arg0: i32, %arg1: memref<8x3200xf32, #tpu.memory_space<vmem>>, %arg2: memref<640x128xbf16, #tpu.memory_space<vmem>>, %arg3: memref<1x640xf32, #tpu.memory_space<vmem>>, %arg4: memref<640x384xbf16, #tpu.memory_space<vmem>>, %arg5: memref<1x384xf32, #tpu.memory_space<vmem>>, %arg6: memref<384x256xbf16, #tpu.memory_space<vmem>>, %arg7: memref<1x256xf32, #tpu.memory_space<vmem>>, %arg8: memref<256x128xbf16, #tpu.memory_space<vmem>>, %arg9: memref<1x128xf32, #tpu.memory_space<vmem>>, %arg10: memref<8x128xf32, #tpu.memory_space<vmem>>) attributes {dimension_semantics = [#tpu.dimension_semantics<parallel>], iteration_bounds = array<i64: 1>, scalar_prefetch = 0 : i64, scratch_operands = 0 : i64, tpu.core_type = #tpu.core_type<tc>, window_params = [{transform_indices = @transform_0, window_bounds = array<i64: 8, 3200>}, {pipeline_mode = #tpu.pipeline_mode<synchronous>, transform_indices = @transform_1, window_bounds = array<i64: 640, 128>}, {pipeline_mode = #tpu.pipeline_mode<synchronous>, transform_indices = @transform_2, window_bounds = array<i64: 1, 640>}, {pipeline_mode = #tpu.pipeline_mode<synchronous>, transform_indices = @transform_3, window_bounds = array<i64: 640, 384>}, {pipeline_mode = #tpu.pipeline_mode<synchronous>, transform_indices = @transform_4, window_bounds = array<i64: 1, 384>}, {pipeline_mode = #tpu.pipeline_mode<synchronous>, transform_indices = @transform_5, window_bounds = array<i64: 384, 256>}, {pipeline_mode = #tpu.pipeline_mode<synchronous>, transform_indices = @transform_6, window_bounds = array<i64: 1, 256>}, {pipeline_mode = #tpu.pipeline_mode<synchronous>, transform_indices = @transform_7, window_bounds = array<i64: 256, 128>}, {pipeline_mode = #tpu.pipeline_mode<synchronous>, transform_indices = @transform_8, window_bounds = array<i64: 1, 128>}, {transform_indices = @transform_9, window_bounds = array<i64: 8, 128>}]} {
    %c0 = arith.constant 0 : index
    %c0_0 = arith.constant 0 : index
    %0 = vector.load %arg2[%c0, %c0_0] : memref<640x128xbf16, #tpu.memory_space<vmem>>, vector<640x128xbf16>
    %c0_1 = arith.constant 0 : index
    %c0_2 = arith.constant 0 : index
    %1 = vector.load %arg1[%c0_1, %c0_2] : memref<8x3200xf32, #tpu.memory_space<vmem>>, vector<8x640xf32>
    %2 = arith.truncf %1 : vector<8x640xf32> to vector<8x640xbf16>
    %cst = arith.constant dense<0.000000e+00> : vector<8x128xf32>
    %3 = tpu.matmul %2, %0, %cst {dimension_numbers = #tpu.dot_dimension_numbers<[1], [0], [0], [1], [0, 0, 1, 1], [], []>} : vector<8x640xbf16>, vector<640x128xbf16>, vector<8x128xf32> -> vector<8x128xf32>
    %c0_3 = arith.constant 0 : index
    %c640 = arith.constant 640 : index
    %4 = vector.load %arg1[%c0_3, %c640] : memref<8x3200xf32, #tpu.memory_space<vmem>>, vector<8x640xf32>
    %5 = arith.truncf %4 : vector<8x640xf32> to vector<8x640xbf16>
    %cst_4 = arith.constant dense<0.000000e+00> : vector<8x128xf32>
    %6 = tpu.matmul %5, %0, %cst_4 {dimension_numbers = #tpu.dot_dimension_numbers<[1], [0], [0], [1], [0, 0, 1, 1], [], []>} : vector<8x640xbf16>, vector<640x128xbf16>, vector<8x128xf32> -> vector<8x128xf32>
    %c0_5 = arith.constant 0 : index
    %c1280 = arith.constant 1280 : index
    %7 = vector.load %arg1[%c0_5, %c1280] : memref<8x3200xf32, #tpu.memory_space<vmem>>, vector<8x640xf32>
    %8 = arith.truncf %7 : vector<8x640xf32> to vector<8x640xbf16>
    %cst_6 = arith.constant dense<0.000000e+00> : vector<8x128xf32>
    %9 = tpu.matmul %8, %0, %cst_6 {dimension_numbers = #tpu.dot_dimension_numbers<[1], [0], [0], [1], [0, 0, 1, 1], [], []>} : vector<8x640xbf16>, vector<640x128xbf16>, vector<8x128xf32> -> vector<8x128xf32>
    %c0_7 = arith.constant 0 : index
    %c1920 = arith.constant 1920 : index
    %10 = vector.load %arg1[%c0_7, %c1920] : memref<8x3200xf32, #tpu.memory_space<vmem>>, vector<8x640xf32>
    %11 = arith.truncf %10 : vector<8x640xf32> to vector<8x640xbf16>
    %cst_8 = arith.constant dense<0.000000e+00> : vector<8x128xf32>
    %12 = tpu.matmul %11, %0, %cst_8 {dimension_numbers = #tpu.dot_dimension_numbers<[1], [0], [0], [1], [0, 0, 1, 1], [], []>} : vector<8x640xbf16>, vector<640x128xbf16>, vector<8x128xf32> -> vector<8x128xf32>
    %c0_9 = arith.constant 0 : index
    %c2560 = arith.constant 2560 : index
    %13 = vector.load %arg1[%c0_9, %c2560] : memref<8x3200xf32, #tpu.memory_space<vmem>>, vector<8x640xf32>
    %14 = arith.truncf %13 : vector<8x640xf32> to vector<8x640xbf16>
    %cst_10 = arith.constant dense<0.000000e+00> : vector<8x128xf32>
    %15 = tpu.matmul %14, %0, %cst_10 {dimension_numbers = #tpu.dot_dimension_numbers<[1], [0], [0], [1], [0, 0, 1, 1], [], []>} : vector<8x640xbf16>, vector<640x128xbf16>, vector<8x128xf32> -> vector<8x128xf32>
    %16 = tpu.concatenate %3, %6, %9, %12, %15 in 1 : vector<8x128xf32>, vector<8x128xf32>, vector<8x128xf32>, vector<8x128xf32>, vector<8x128xf32> -> vector<8x640xf32>
    %c0_11 = arith.constant 0 : index
    %c0_12 = arith.constant 0 : index
    %17 = vector.load %arg3[%c0_11, %c0_12] : memref<1x640xf32, #tpu.memory_space<vmem>>, vector<1x640xf32>
    %18 = vector.broadcast %17 : vector<1x640xf32> to vector<8x640xf32>
    %19 = arith.addf %16, %18 : vector<8x640xf32>
    %cst_13 = arith.constant 0.000000e+00 : f32
    %20 = vector.broadcast %cst_13 : f32 to vector<8x640xf32>
    %21 = arith.maximumf %19, %20 : vector<8x640xf32>
    %22 = arith.truncf %21 : vector<8x640xf32> to vector<8x640xbf16>
    %c0_14 = arith.constant 0 : index
    %c0_15 = arith.constant 0 : index
    %23 = vector.load %arg4[%c0_14, %c0_15] : memref<640x384xbf16, #tpu.memory_space<vmem>>, vector<640x384xbf16>
    %cst_16 = arith.constant dense<0.000000e+00> : vector<8x384xf32>
    %24 = tpu.matmul %22, %23, %cst_16 {dimension_numbers = #tpu.dot_dimension_numbers<[1], [0], [0], [1], [0, 0, 1, 1], [], []>} : vector<8x640xbf16>, vector<640x384xbf16>, vector<8x384xf32> -> vector<8x384xf32>
    %c0_17 = arith.constant 0 : index
    %c0_18 = arith.constant 0 : index
    %25 = vector.load %arg5[%c0_17, %c0_18] : memref<1x384xf32, #tpu.memory_space<vmem>>, vector<1x384xf32>
    %26 = vector.broadcast %25 : vector<1x384xf32> to vector<8x384xf32>
    %27 = arith.addf %24, %26 : vector<8x384xf32>
    %cst_19 = arith.constant 0.000000e+00 : f32
    %28 = vector.broadcast %cst_19 : f32 to vector<8x384xf32>
    %29 = arith.maximumf %27, %28 : vector<8x384xf32>
    %30 = arith.truncf %29 : vector<8x384xf32> to vector<8x384xbf16>
    %c0_20 = arith.constant 0 : index
    %c0_21 = arith.constant 0 : index
    %31 = vector.load %arg6[%c0_20, %c0_21] : memref<384x256xbf16, #tpu.memory_space<vmem>>, vector<384x256xbf16>
    %cst_22 = arith.constant dense<0.000000e+00> : vector<8x256xf32>
    %32 = tpu.matmul %30, %31, %cst_22 {dimension_numbers = #tpu.dot_dimension_numbers<[1], [0], [0], [1], [0, 0, 1, 1], [], []>} : vector<8x384xbf16>, vector<384x256xbf16>, vector<8x256xf32> -> vector<8x256xf32>
    %c0_23 = arith.constant 0 : index
    %c0_24 = arith.constant 0 : index
    %33 = vector.load %arg7[%c0_23, %c0_24] : memref<1x256xf32, #tpu.memory_space<vmem>>, vector<1x256xf32>
    %34 = vector.broadcast %33 : vector<1x256xf32> to vector<8x256xf32>
    %35 = arith.addf %32, %34 : vector<8x256xf32>
    %cst_25 = arith.constant 0.000000e+00 : f32
    %36 = vector.broadcast %cst_25 : f32 to vector<8x256xf32>
    %37 = arith.maximumf %35, %36 : vector<8x256xf32>
    %38 = arith.truncf %37 : vector<8x256xf32> to vector<8x256xbf16>
    %c0_26 = arith.constant 0 : index
    %c0_27 = arith.constant 0 : index
    %39 = vector.load %arg8[%c0_26, %c0_27] : memref<256x128xbf16, #tpu.memory_space<vmem>>, vector<256x128xbf16>
    %cst_28 = arith.constant dense<0.000000e+00> : vector<8x128xf32>
    %40 = tpu.matmul %38, %39, %cst_28 {dimension_numbers = #tpu.dot_dimension_numbers<[1], [0], [0], [1], [0, 0, 1, 1], [], []>} : vector<8x256xbf16>, vector<256x128xbf16>, vector<8x128xf32> -> vector<8x128xf32>
    %c0_29 = arith.constant 0 : index
    %c0_30 = arith.constant 0 : index
    %41 = vector.load %arg9[%c0_29, %c0_30] : memref<1x128xf32, #tpu.memory_space<vmem>>, vector<1x128xf32>
    %42 = vector.broadcast %41 : vector<1x128xf32> to vector<8x128xf32>
    %43 = arith.addf %40, %42 : vector<8x128xf32>
    %c0_31 = arith.constant 0 : index
    %c0_32 = arith.constant 0 : index
    %44 = vector.load %arg10[%c0_31, %c0_32] : memref<8x128xf32, #tpu.memory_space<vmem>>, vector<8x128xf32>
    tpu.vector_store %arg10[%c0_31, %c0_32], %43 {strides = array<i32>} : memref<8x128xf32, #tpu.memory_space<vmem>>, vector<8x128xf32>,
    return
  }
  func.func @transform_0(%arg0: i32) -> (i32, i32) {
    %c0_i32 = arith.constant 0 : i32
    %c0_i32_0 = arith.constant 0 : i32
    return %arg0, %c0_i32 : i32, i32
  }
  func.func @transform_1(%arg0: i32) -> (i32, i32) {
    %c0_i32 = arith.constant 0 : i32
    %c0_i32_0 = arith.constant 0 : i32
    %c0_i32_1 = arith.constant 0 : i32
    return %c0_i32, %c0_i32_0 : i32, i32
  }
  func.func @transform_2(%arg0: i32) -> (i32, i32) {
    %c0_i32 = arith.constant 0 : i32
    %c0_i32_0 = arith.constant 0 : i32
    %c0_i32_1 = arith.constant 0 : i32
    return %c0_i32, %c0_i32_0 : i32, i32
  }
  func.func @transform_3(%arg0: i32) -> (i32, i32) {
    %c0_i32 = arith.constant 0 : i32
    %c0_i32_0 = arith.constant 0 : i32
    %c0_i32_1 = arith.constant 0 : i32
    return %c0_i32, %c0_i32_0 : i32, i32
  }
  func.func @transform_4(%arg0: i32) -> (i32, i32) {
    %c0_i32 = arith.constant 0 : i32
    %c0_i32_0 = arith.constant 0 : i32
    %c0_i32_1 = arith.constant 0 : i32
    return %c0_i32, %c0_i32_0 : i32, i32
  }
  func.func @transform_5(%arg0: i32) -> (i32, i32) {
    %c0_i32 = arith.constant 0 : i32
    %c0_i32_0 = arith.constant 0 : i32
    %c0_i32_1 = arith.constant 0 : i32
    return %c0_i32, %c0_i32_0 : i32, i32
  }
  func.func @transform_6(%arg0: i32) -> (i32, i32) {
    %c0_i32 = arith.constant 0 : i32
    %c0_i32_0 = arith.constant 0 : i32
    %c0_i32_1 = arith.constant 0 : i32
    return %c0_i32, %c0_i32_0 : i32, i32
  }
  func.func @transform_7(%arg0: i32) -> (i32, i32) {
    %c0_i32 = arith.constant 0 : i32
    %c0_i32_0 = arith.constant 0 : i32
    %c0_i32_1 = arith.constant 0 : i32
    return %c0_i32, %c0_i32_0 : i32, i32
  }
  func.func @transform_8(%arg0: i32) -> (i32, i32) {
    %c0_i32 = arith.constant 0 : i32
    %c0_i32_0 = arith.constant 0 : i32
    %c0_i32_1 = arith.constant 0 : i32
    return %c0_i32, %c0_i32_0 : i32, i32
  }
  func.func @transform_9(%arg0: i32) -> (i32, i32) {
    %c0_i32 = arith.constant 0 : i32
    %c0_i32_0 = arith.constant 0 : i32
    return %arg0, %c0_i32 : i32, i32
  }
}

</mosaic_0001>

<bundles_post_ra>
// kernel: cnn2_forward.1
= control target key start
LH: loop header
LB: loop body
LE: loop exit
PB: predicated region body
PF: predicated region fallthrough
CT: control target
= control target key end

     0   :  { %s5096_s1 = inlined_call_operand.vmem [shape: bf16[640,128], index: 1, kind: input, shape index: {}]   ;;  %s5097_s0 = inlined_call_operand.vmem [shape: f32[8,3200], index: 0, kind: input, shape index: {}]   ;;  %s5098_s3 = inlined_call_operand.vmem [shape: bf16[640,384], index: 3, kind: input, shape index: {}]   ;;  %s5099_s2 = inlined_call_operand.vmem [shape: f32[1,640], index: 2, kind: input, shape index: {}]   ;;  %s5100_s4 = inlined_call_operand.vmem [shape: f32[1,384], index: 4, kind: input, shape index: {}]   ;;  %s5101_s5 = inlined_call_operand.vmem [shape: bf16[384,256], index: 5, kind: input, shape index: {}]   ;;  %s5102_s7 = inlined_call_operand.vmem [shape: bf16[256,128], index: 7, kind: input, shape index: {}]   ;;  %s5103_s6 = inlined_call_operand.vmem [shape: f32[1,256], index: 6, kind: input, shape index: {}]   ;;  %s5104_s8 = inlined_call_operand.vmem [shape: f32[1,128], index: 8, kind: input, shape index: {}]   ;;  %s5105_s9 = inlined_call_operand.vmem [shape: f32[8,128], index: 9, kind: output, shape index: {}]  }
   0x1   :  { %v3476_v0 = vld [vmem:[%s5096_s1 + $0x38] sm:$0xff]  ;;  %v3498_v4 = vld [vmem:[%s5096_s1 + $0x30] sm:$0xff]  ;;  %v3522_v8 = vld [vmem:[%s5096_s1 + $0x28] sm:$0xff] }
   0x2   :  { %v3481_v1 = vld [vmem:[%s5096_s1 + $0x78] sm:$0xff]  ;;  %362 = vmatpush.bf16.msra.mxu0 %v3476_v0  ;;  %v3503_v5 = vld [vmem:[%s5096_s1 + $0x70] sm:$0xff]  ;;  %v3527_v9 = vld [vmem:[%s5096_s1 + $0x68] sm:$0xff] }
   0x3   :  { %v3486_v2 = vld [vmem:[%s5096_s1 + $0xb8] sm:$0xff]  ;;  %375 = vmatpush.bf16.msra.mxu1 %v3481_v1  ;;  %v3510_v6 = vld [vmem:[%s5096_s1 + $0xb0] sm:$0xff]  ;;  %v3534_v10 = vld [vmem:[%s5096_s1 + $0xa8] sm:$0xff] }
   0x4   :  { %v3491_v3 = vld [vmem:[%s5096_s1 + $0xf8] sm:$0xff]  ;;  %388 = vmatpush.bf16.msra.mxu2 %v3486_v2  ;;  %v3515_v7 = vld [vmem:[%s5096_s1 + $0xf0] sm:$0xff]  ;;  %v3539_v11 = vld [vmem:[%s5096_s1 + $0xe8] sm:$0xff] }
   0x5   :  { %401 = vmatpush.bf16.msra.mxu3 %v3491_v3  ;;  %v3546_v12 = vld [vmem:[%s5096_s1 + $0x20] sm:$0xff]  ;;  %v3570_v16 = vld [vmem:[%s5096_s1 + $0x18] sm:$0xff]  ;;  %v3594_v20 = vld [vmem:[%s5096_s1 + $0x10] sm:$0xff] }
   0x6   :  { %363 = vmatpush.bf16.msra.mxu0 %v3498_v4  ;;  %v3551_v13 = vld [vmem:[%s5096_s1 + $0x60] sm:$0xff]  ;;  %v3575_v17 = vld [vmem:[%s5096_s1 + $0x58] sm:$0xff]  ;;  %v3599_v21 = vld [vmem:[%s5096_s1 + $0x50] sm:$0xff] }
   0x7   :  { %376 = vmatpush.bf16.msra.mxu1 %v3503_v5  ;;  %v3558_v14 = vld [vmem:[%s5096_s1 + $0xa0] sm:$0xff]  ;;  %v3582_v18 = vld [vmem:[%s5096_s1 + $0x98] sm:$0xff]  ;;  %v3606_v22 = vld [vmem:[%s5096_s1 + $0x90] sm:$0xff] }
   0x8   :  { %389 = vmatpush.bf16.msra.mxu2 %v3510_v6  ;;  %v3563_v15 = vld [vmem:[%s5096_s1 + $0xe0] sm:$0xff]  ;;  %v3587_v19 = vld [vmem:[%s5096_s1 + $0xd8] sm:$0xff]  ;;  %v3611_v23 = vld [vmem:[%s5096_s1 + $0xd0] sm:$0xff] }
   0x9   :  { %402 = vmatpush.bf16.msra.mxu3 %v3515_v7  ;;  %v3618_v24 = vld [vmem:[%s5096_s1 + $0x8] sm:$0xff]  ;;  %v3642_v28 = vld [vmem:[%s5096_s1] sm:$0xff]  ;;  %v3662_v32 = vld [vmem:[%s5096_s1 + $0x138] sm:$0xff] }
   0xa   :  { %364 = vmatpush.bf16.msra.mxu0 %v3522_v8  ;;  %v3623_v25 = vld [vmem:[%s5096_s1 + $0x48] sm:$0xff]  ;;  %v3647_v29 = vld [vmem:[%s5096_s1 + $0x40] sm:$0xff]  ;;  %v114_v33 = vld [vmem:[%s5097_s0 + $0x10] sm:$0xff] }
   0xb   :  { %377 = vmatpush.bf16.msra.mxu1 %v3527_v9  ;;  %v3630_v26 = vld [vmem:[%s5096_s1 + $0x88] sm:$0xff]  ;;  %v112_v30 = vld [vmem:[%s5097_s0] sm:$0xff]  ;;  %v119_v37 = vpack.c.bf16 %v114_v33, %v114_v33  ;;  %v115_v38 = vld [vmem:[%s5097_s0 + $0x18] sm:$0xff] }
   0xc   :  { %390 = vmatpush.bf16.msra.mxu2 %v3534_v10  ;;  %v3635_v27 = vld [vmem:[%s5096_s1 + $0xc8] sm:$0xff]  ;;  %v3657_v31 = vld [vmem:[%s5096_s1 + $0x80] sm:$0xff]  ;;  %v117_v36 = vpack.c.bf16 %v112_v30, %v112_v30  ;;  %v3685_v39 = vld [vmem:[%s5096_s1 + $0x130] sm:$0xff]  ;;  %v120_v41 = vpack.c.bf16 %v115_v38, %v115_v38 }
   0xd   :  { %403 = vmatpush.bf16.msra.mxu3 %v3539_v11  ;;  %v113_v34 = vld [vmem:[%s5097_s0 + $0x8] sm:$0xff]  ;;  %v3673_v35 = vld [vmem:[%s5096_s1 + $0xc0] sm:$0xff]  ;;  %v3713_v44 = vld [vmem:[%s5096_s1 + $0x118] sm:$0xff] }
   0xe   :  { %365 = vmatpush.bf16.msra.mxu0 %v3546_v12  ;;  %v118_v40 = vpack.c.bf16 %v113_v34, %v113_v34  ;;  %v3695_v42 = vld [vmem:[%s5096_s1 + $0x128] sm:$0xff]  ;;  %v3704_v43 = vld [vmem:[%s5096_s1 + $0x120] sm:$0xff]  ;;  %v3722_v45 = vld [vmem:[%s5096_s1 + $0x110] sm:$0xff] }
   0xf   :  { %378 = vmatpush.bf16.msra.mxu1 %v3551_v13  ;;  %v3731_v46 = vld [vmem:[%s5096_s1 + $0x108] sm:$0xff]  ;;  %v3740_v47 = vld [vmem:[%s5096_s1 + $0x100] sm:$0xff]  ;;  %v428_v50 = vld [vmem:[%s5097_s0 + $0x30] sm:$0xff] }
  0x10   :  { %391 = vmatpush.bf16.msra.mxu2 %v3558_v14  ;;  %v116_v48 = vld [vmem:[%s5097_s0 + $0x20] sm:$0xff]  ;;  %v427_v49 = vld [vmem:[%s5097_s0 + $0x28] sm:$0xff]  ;;  %v429_v52 = vld [vmem:[%s5097_s0 + $0x38] sm:$0xff]  ;;  %v433_v54 = vpack.c.bf16 %v428_v50, %v428_v50 }
  0x11   :  { %404 = vmatpush.bf16.msra.mxu3 %v3563_v15  ;;  %v121_v51 = vpack.c.bf16 %v116_v48, %v116_v48  ;;  %v432_v53 = vpack.c.bf16 %v427_v49, %v427_v49  ;;  %v434_v55 = vpack.c.bf16 %v429_v52, %v429_v52  ;;  %v430_v56 = vld [vmem:[%s5097_s0 + $0x40] sm:$0xff]  ;;  %v431_v57 = vld [vmem:[%s5097_s0 + $0x48] sm:$0xff]  ;;  %v502_v58 = vld [vmem:[%s5097_s0 + $0x50] sm:$0xff] }
  0x12   :  { %366 = vmatpush.bf16.msra.mxu0 %v3570_v16  ;;  %v435_v59 = vpack.c.bf16 %v430_v56, %v430_v56  ;;  %v436_v60 = vpack.c.bf16 %v431_v57, %v431_v57  ;;  %v503_v61 = vld [vmem:[%s5097_s0 + $0x58] sm:$0xff]  ;;  %v507_v62 = vpack.c.bf16 %v502_v58, %v502_v58  ;;  %v506_v30 = vld [vmem:[%s5097_s0 + $0x70] sm:$0xff]  ;;  %v504_v33 = vld [vmem:[%s5097_s0 + $0x60] sm:$0xff] }
  0x13   :  { %379 = vmatpush.bf16.msra.mxu1 %v3575_v17  ;;  %v508_v63 = vpack.c.bf16 %v503_v61, %v503_v61  ;;  %v505_v34 = vld [vmem:[%s5097_s0 + $0x68] sm:$0xff]  ;;  %v509_v38 = vpack.c.bf16 %v504_v33, %v504_v33  ;;  %v578_v48 = vld [vmem:[%s5097_s0 + $0x80] sm:$0xff]  ;;  %v580_v50 = vld [vmem:[%s5097_s0 + $0x90] sm:$0xff] }
  0x14   :  { %392 = vmatpush.bf16.msra.mxu2 %v3582_v18  ;;  %v579_v49 = vld [vmem:[%s5097_s0 + $0x88] sm:$0xff]  ;;  %v583_v52 = vpack.c.bf16 %v578_v48, %v578_v48  ;;  %v3281_v57 = vld [vmem:[%s5098_s3 + $0x158] sm:$0xf0]  ;;  %v2620_v33 = vld [vmem:[%s5098_s3 + $0x138] sm:$0xf] }
  0x15   :  { %405 = vmatpush.bf16.msra.mxu3 %v3587_v19 }
  0x16   :  { %367 = vmatpush.bf16.msra.mxu0 %v3594_v20 }
  0x17   :  { %380 = vmatpush.bf16.msra.mxu1 %v3599_v21 }
  0x18   :  { %393 = vmatpush.bf16.msra.mxu2 %v3606_v22 }
  0x19   :  { %406 = vmatpush.bf16.msra.mxu3 %v3611_v23 }
  0x1a   :  { %368 = vmatpush.bf16.msra.mxu0 %v3618_v24 }
  0x1b   :  { %381 = vmatpush.bf16.msra.mxu1 %v3623_v25 }
  0x1c   :  { %394 = vmatpush.bf16.msra.mxu2 %v3630_v26 }
  0x1d   :  { %407 = vmatpush.bf16.msra.mxu3 %v3635_v27 }
  0x1e   :  { %369 = vmatpush.bf16.msra.mxu0 %v3642_v28 }
  0x1f   :  { %382 = vmatpush.bf16.msra.mxu1 %v3647_v29 }
  0x20   :  { %395 = vmatpush.bf16.msra.mxu2 %v3657_v31 }
  0x21   :  { %408 = vmatpush.bf16.msra.mxu3 %v3673_v35  ;;  %370 = vmatmul.bf16.vlgmr.msra.gmra.mxu0 %v117_v36  ;;  %v511_v36 = vpack.c.bf16 %v506_v30, %v506_v30  ;;  %v3251_v30 = vld [vmem:[%s5098_s3 + $0x68] sm:$0xf0] }
  0x22   :  { %414 = vmatpush.bf16.msrb.mxu0 %v3662_v32  ;;  %383 = vmatmul.bf16.vlgmr.msra.gmra.mxu1 %v118_v40  ;;  %v510_v40 = vpack.c.bf16 %v505_v34, %v505_v34 }
  0x23   :  { %437 = vmatpush.bf16.msrb.mxu1 %v3476_v0  ;;  %396 = vmatmul.bf16.vlgmr.msra.gmra.mxu2 %v119_v37  ;;  %v577_v37 = vld [vmem:[%s5097_s0 + $0x78] sm:$0xff] }
  0x24   :  { %450 = vmatpush.bf16.msrb.mxu2 %v3481_v1  ;;  %409 = vmatmul.bf16.vlgmr.msra.gmra.mxu3 %v120_v41  ;;  %v582_v41 = vpack.c.bf16 %v577_v37, %v577_v37  ;;  %v3299_v37 = vld [vmem:[%s5098_s3 + $0x1e8] sm:$0xf0] }
  0x25   :  { %463 = vmatpush.bf16.msrb.mxu3 %v3486_v2 }
  0x26   :  { %415 = vmatpush.bf16.msrb.mxu0 %v3685_v39 }
  0x27   :  { %438 = vmatpush.bf16.msrb.mxu1 %v3498_v4 }
  0x28   :  { %451 = vmatpush.bf16.msrb.mxu2 %v3503_v5 }
  0x29   :  { %464 = vmatpush.bf16.msrb.mxu3 %v3510_v6 }
  0x2a   :  { %416 = vmatpush.bf16.msrb.mxu0 %v3695_v42 }
  0x2b   :  { %439 = vmatpush.bf16.msrb.mxu1 %v3522_v8 }
  0x2c   :  { %452 = vmatpush.bf16.msrb.mxu2 %v3527_v9 }
  0x2d   :  { %465 = vmatpush.bf16.msrb.mxu3 %v3534_v10 }
  0x2e   :  { %417 = vmatpush.bf16.msrb.mxu0 %v3704_v43 }
  0x2f   :  { %440 = vmatpush.bf16.msrb.mxu1 %v3546_v12 }
  0x30   :  { %453 = vmatpush.bf16.msrb.mxu2 %v3551_v13 }
  0x31   :  { %466 = vmatpush.bf16.msrb.mxu3 %v3558_v14 }
  0x32   :  { %418 = vmatpush.bf16.msrb.mxu0 %v3713_v44 }
  0x33   :  { %441 = vmatpush.bf16.msrb.mxu1 %v3570_v16 }
  0x34   :  { %454 = vmatpush.bf16.msrb.mxu2 %v3575_v17 }
  0x35   :  { %467 = vmatpush.bf16.msrb.mxu3 %v3582_v18 }
  0x36   :  { %419 = vmatpush.bf16.msrb.mxu0 %v3722_v45 }
  0x37   :  { %442 = vmatpush.bf16.msrb.mxu1 %v3594_v20 }
  0x38   :  { %455 = vmatpush.bf16.msrb.mxu2 %v3599_v21 }
  0x39   :  { %468 = vmatpush.bf16.msrb.mxu3 %v3606_v22 }
  0x3a   :  { %420 = vmatpush.bf16.msrb.mxu0 %v3731_v46 }
  0x3b   :  { %443 = vmatpush.bf16.msrb.mxu1 %v3618_v24 }
  0x3c   :  { %456 = vmatpush.bf16.msrb.mxu2 %v3623_v25 }
  0x3d   :  { %469 = vmatpush.bf16.msrb.mxu3 %v3630_v26 }
  0x3e   :  { %421 = vmatpush.bf16.msrb.mxu0 %v3740_v47 }
  0x3f   :  { %444 = vmatpush.bf16.msrb.mxu1 %v3642_v28 }
  0x40   :  { %457 = vmatpush.bf16.msrb.mxu2 %v3647_v29 }
  0x41   :  { %470 = vmatpush.bf16.msrb.mxu3 %v3657_v31  ;;  %422 = vmatmul.bf16.vlgmr.msrb.gmra.mxu0 %v121_v51  ;;  %v581_v51 = vld [vmem:[%s5097_s0 + $0x98] sm:$0xff] }
  0x42   :  { %476 = vmatpush.bf16.msra.mxu0 %v3491_v3  ;;  %445 = vmatmul.bf16.vlgmr.msrb.gmra.mxu1 %v432_v53  ;;  %v584_v53 = vpack.c.bf16 %v579_v49, %v579_v49  ;;  %v3248_v49 = vld [vmem:[%s5098_s3 + $0x50] sm:$0xf0] }
  0x43   :  { %489 = vmatpush.bf16.msra.mxu1 %v3662_v32  ;;  %458 = vmatmul.bf16.vlgmr.msrb.gmra.mxu2 %v433_v54  ;;  %v585_v54 = vpack.c.bf16 %v580_v50, %v580_v50  ;;  %v2608_v50 = vld [vmem:[%s5098_s3 + $0x120] sm:$0xf] }
  0x44   :  { %512 = vmatpush.bf16.msra.mxu2 %v3476_v0  ;;  %471 = vmatmul.bf16.vlgmr.msrb.gmra.mxu3 %v434_v55  ;;  %v586_v55 = vpack.c.bf16 %v581_v51, %v581_v51  ;;  %v3275_v51 = vld [vmem:[%s5098_s3 + $0x128] sm:$0xf0] }
  0x45   :  { %525 = vmatpush.bf16.msra.mxu3 %v3481_v1 }
  0x46   :  { %477 = vmatpush.bf16.msra.mxu0 %v3515_v7 }
  0x47   :  { %490 = vmatpush.bf16.msra.mxu1 %v3685_v39 }
  0x48   :  { %513 = vmatpush.bf16.msra.mxu2 %v3498_v4 }
  0x49   :  { %526 = vmatpush.bf16.msra.mxu3 %v3503_v5 }
  0x4a   :  { %478 = vmatpush.bf16.msra.mxu0 %v3539_v11 }
  0x4b   :  { %491 = vmatpush.bf16.msra.mxu1 %v3695_v42 }
  0x4c   :  { %514 = vmatpush.bf16.msra.mxu2 %v3522_v8 }
  0x4d   :  { %527 = vmatpush.bf16.msra.mxu3 %v3527_v9 }
  0x4e   :  { %479 = vmatpush.bf16.msra.mxu0 %v3563_v15 }
  0x4f   :  { %492 = vmatpush.bf16.msra.mxu1 %v3704_v43 }
  0x50   :  { %515 = vmatpush.bf16.msra.mxu2 %v3546_v12 }
  0x51   :  { %528 = vmatpush.bf16.msra.mxu3 %v3551_v13 }
  0x52   :  { %480 = vmatpush.bf16.msra.mxu0 %v3587_v19 }
  0x53   :  { %493 = vmatpush.bf16.msra.mxu1 %v3713_v44 }
  0x54   :  { %516 = vmatpush.bf16.msra.mxu2 %v3570_v16 }
  0x55   :  { %529 = vmatpush.bf16.msra.mxu3 %v3575_v17 }
  0x56   :  { %481 = vmatpush.bf16.msra.mxu0 %v3611_v23 }
  0x57   :  { %494 = vmatpush.bf16.msra.mxu1 %v3722_v45 }
  0x58   :  { %517 = vmatpush.bf16.msra.mxu2 %v3594_v20 }
  0x59   :  { %530 = vmatpush.bf16.msra.mxu3 %v3599_v21 }
  0x5a   :  { %482 = vmatpush.bf16.msra.mxu0 %v3635_v27 }
  0x5b   :  { %495 = vmatpush.bf16.msra.mxu1 %v3731_v46 }
  0x5c   :  { %518 = vmatpush.bf16.msra.mxu2 %v3618_v24 }
  0x5d   :  { %531 = vmatpush.bf16.msra.mxu3 %v3623_v25 }
  0x5e   :  { %483 = vmatpush.bf16.msra.mxu0 %v3673_v35 }
  0x5f   :  { %496 = vmatpush.bf16.msra.mxu1 %v3740_v47 }
  0x60   :  { %519 = vmatpush.bf16.msra.mxu2 %v3642_v28 }
  0x61   :  { %532 = vmatpush.bf16.msra.mxu3 %v3647_v29  ;;  %484 = vmatmul.bf16.vlgmr.msra.gmra.mxu0 %v435_v59 }
  0x62   :  { %538 = vmatpush.bf16.msrb.mxu0 %v3486_v2  ;;  %497 = vmatmul.bf16.vlgmr.msra.gmra.mxu1 %v436_v60  ;;  %v2716_v60 = vld [vmem:[%s5098_s3 + $0x1f8] sm:$0xf] }
  0x63   :  { %551 = vmatpush.bf16.msrb.mxu1 %v3491_v3  ;;  %520 = vmatmul.bf16.vlgmr.msra.gmra.mxu2 %v507_v62 }
  0x64   :  { %564 = vmatpush.bf16.msrb.mxu2 %v3662_v32  ;;  %533 = vmatmul.bf16.vlgmr.msra.gmra.mxu3 %v508_v63 }
  0x65   :  { %587 = vmatpush.bf16.msrb.mxu3 %v3476_v0 }
  0x66   :  { %539 = vmatpush.bf16.msrb.mxu0 %v3510_v6 }
  0x67   :  { %552 = vmatpush.bf16.msrb.mxu1 %v3515_v7 }
  0x68   :  { %565 = vmatpush.bf16.msrb.mxu2 %v3685_v39 }
  0x69   :  { %588 = vmatpush.bf16.msrb.mxu3 %v3498_v4 }
  0x6a   :  { %540 = vmatpush.bf16.msrb.mxu0 %v3534_v10 }
  0x6b   :  { %553 = vmatpush.bf16.msrb.mxu1 %v3539_v11 }
  0x6c   :  { %566 = vmatpush.bf16.msrb.mxu2 %v3695_v42 }
  0x6d   :  { %589 = vmatpush.bf16.msrb.mxu3 %v3522_v8 }
  0x6e   :  { %541 = vmatpush.bf16.msrb.mxu0 %v3558_v14 }
  0x6f   :  { %554 = vmatpush.bf16.msrb.mxu1 %v3563_v15 }
  0x70   :  { %567 = vmatpush.bf16.msrb.mxu2 %v3704_v43 }
  0x71   :  { %590 = vmatpush.bf16.msrb.mxu3 %v3546_v12 }
  0x72   :  { %542 = vmatpush.bf16.msrb.mxu0 %v3582_v18 }
  0x73   :  { %555 = vmatpush.bf16.msrb.mxu1 %v3587_v19 }
  0x74   :  { %568 = vmatpush.bf16.msrb.mxu2 %v3713_v44 }
  0x75   :  { %591 = vmatpush.bf16.msrb.mxu3 %v3570_v16 }
  0x76   :  { %543 = vmatpush.bf16.msrb.mxu0 %v3606_v22 }
  0x77   :  { %556 = vmatpush.bf16.msrb.mxu1 %v3611_v23 }
  0x78   :  { %569 = vmatpush.bf16.msrb.mxu2 %v3722_v45 }
  0x79   :  { %592 = vmatpush.bf16.msrb.mxu3 %v3594_v20 }
  0x7a   :  { %544 = vmatpush.bf16.msrb.mxu0 %v3630_v26 }
  0x7b   :  { %557 = vmatpush.bf16.msrb.mxu1 %v3635_v27 }
  0x7c   :  { %570 = vmatpush.bf16.msrb.mxu2 %v3731_v46 }
  0x7d   :  { %593 = vmatpush.bf16.msrb.mxu3 %v3618_v24 }
  0x7e   :  { %545 = vmatpush.bf16.msrb.mxu0 %v3657_v31 }
  0x7f   :  { %558 = vmatpush.bf16.msrb.mxu1 %v3673_v35 }
  0x80   :  { %571 = vmatpush.bf16.msrb.mxu2 %v3740_v47 }
  0x81   :  { %594 = vmatpush.bf16.msrb.mxu3 %v3642_v28  ;;  %546 = vmatmul.bf16.vlgmr.msrb.gmra.mxu0 %v509_v38 }
  0x82   :  { %600 = vmatpush.bf16.msra.mxu0 %v3481_v1  ;;  %559 = vmatmul.bf16.vlgmr.msrb.gmra.mxu1 %v510_v40 }
  0x83   :  { %613 = vmatpush.bf16.msra.mxu1 %v3486_v2  ;;  %572 = vmatmul.bf16.vlgmr.msrb.gmra.mxu2 %v511_v36  ;;  %v2704_v36 = vld [vmem:[%s5098_s3 + $0x1e0] sm:$0xf] }
  0x84   :  { %626 = vmatpush.bf16.msra.mxu2 %v3491_v3  ;;  %595 = vmatmul.bf16.vlgmr.msrb.gmra.mxu3 %v582_v41 }
  0x85   :  { %639 = vmatpush.bf16.msra.mxu3 %v3662_v32 }
  0x86   :  { %601 = vmatpush.bf16.msra.mxu0 %v3503_v5 }
  0x87   :  { %614 = vmatpush.bf16.msra.mxu1 %v3510_v6 }
  0x88   :  { %627 = vmatpush.bf16.msra.mxu2 %v3515_v7 }
  0x89   :  { %640 = vmatpush.bf16.msra.mxu3 %v3685_v39 }
  0x8a   :  { %602 = vmatpush.bf16.msra.mxu0 %v3527_v9 }
  0x8b   :  { %615 = vmatpush.bf16.msra.mxu1 %v3534_v10 }
  0x8c   :  { %628 = vmatpush.bf16.msra.mxu2 %v3539_v11 }
  0x8d   :  { %641 = vmatpush.bf16.msra.mxu3 %v3695_v42 }
  0x8e   :  { %603 = vmatpush.bf16.msra.mxu0 %v3551_v13 }
  0x8f   :  { %616 = vmatpush.bf16.msra.mxu1 %v3558_v14 }
  0x90   :  { %629 = vmatpush.bf16.msra.mxu2 %v3563_v15 }
  0x91   :  { %642 = vmatpush.bf16.msra.mxu3 %v3704_v43 }
  0x92   :  { %604 = vmatpush.bf16.msra.mxu0 %v3575_v17 }
  0x93   :  { %617 = vmatpush.bf16.msra.mxu1 %v3582_v18 }
  0x94   :  { %630 = vmatpush.bf16.msra.mxu2 %v3587_v19 }
  0x95   :  { %643 = vmatpush.bf16.msra.mxu3 %v3713_v44 }
  0x96   :  { %605 = vmatpush.bf16.msra.mxu0 %v3599_v21 }
  0x97   :  { %618 = vmatpush.bf16.msra.mxu1 %v3606_v22 }
  0x98   :  { %631 = vmatpush.bf16.msra.mxu2 %v3611_v23 }
  0x99   :  { %644 = vmatpush.bf16.msra.mxu3 %v3722_v45 }
  0x9a   :  { %606 = vmatpush.bf16.msra.mxu0 %v3623_v25 }
  0x9b   :  { %619 = vmatpush.bf16.msra.mxu1 %v3630_v26 }
  0x9c   :  { %632 = vmatpush.bf16.msra.mxu2 %v3635_v27 }
  0x9d   :  { %645 = vmatpush.bf16.msra.mxu3 %v3731_v46 }
  0x9e   :  { %607 = vmatpush.bf16.msra.mxu0 %v3647_v29 }
  0x9f   :  { %620 = vmatpush.bf16.msra.mxu1 %v3657_v31 }
  0xa0   :  { %633 = vmatpush.bf16.msra.mxu2 %v3673_v35 }
  0xa1   :  { %646 = vmatpush.bf16.msra.mxu3 %v3740_v47  ;;  %608 = vmatmul.bf16.vlgmr.msra.gmra.mxu0 %v583_v52 }
  0xa2   :  { %662 = vmatpush.bf16.msrb.mxu0 %v3476_v0  ;;  %621 = vmatmul.bf16.vlgmr.msra.gmra.mxu1 %v584_v53  ;;  %v3903_v0 = vpop.f32.mrf.mxu0  ;;  %v2705_v53 = vor.u32 %v3299_v37, %v2704_v36 }
  0xa3   :  { %675 = vmatpush.bf16.msrb.mxu1 %v3481_v1  ;;  %634 = vmatmul.bf16.vlgmr.msra.gmra.mxu2 %v585_v54  ;;  %v3906_v1 = vpop.f32.mrf.mxu1  ;;  %v2692_v54 = vld [vmem:[%s5098_s3 + $0x1c8] sm:$0xf] }
  0xa4   :  { %647 = vmatmul.bf16.vlgmr.msra.gmra.mxu3 %v586_v55  ;;  %688 = vmatpush.bf16.msrb.mxu2 %v3486_v2  ;;  %v385_v62 = vadd.f32 %v3906_v1, %v3903_v0  ;;  %v3296_v55 = vld [vmem:[%s5098_s3 + $0x1d0] sm:$0xf0] }
  0xa5   :  { %701 = vmatpush.bf16.msrb.mxu3 %v3491_v3 }
  0xa6   :  { %663 = vmatpush.bf16.msrb.mxu0 %v3498_v4  ;;  %v3913_v2 = vpop.f32.mrf.mxu2 }
  0xa7   :  { %676 = vmatpush.bf16.msrb.mxu1 %v3503_v5  ;;  %v3918_v4 = vpop.f32.mrf.mxu3  ;;  %v398_v40 = vadd.f32 %v3913_v2, %v385_v62  ;;  %v2609_v2 = vor.u32 %v3275_v51, %v2608_v50  ;;  %v3283_v62 = vld [vmem:[%s5098_s3 + $0x16c] sm:$0xf]  ;;  %v2634_v50 = vld [vmem:[%s5098_s3 + $0x15c] sm:$0xf0] }
  0xa8   :  { %689 = vmatpush.bf16.msrb.mxu2 %v3510_v6  ;;  %v2548_v6 = vld [vmem:[%s5098_s3 + $0xa8] sm:$0xf] }
  0xa9   :  { %702 = vmatpush.bf16.msrb.mxu3 %v3515_v7  ;;  %v3260_v7 = vld [vmem:[%s5098_s3 + $0xb0] sm:$0xf0]  ;;  %v411_v1 = vadd.f32 %v3918_v4, %v398_v40  ;;  %v3329_v40 = vld [vmem:[%s5098_s3 + $0x2d8] sm:$0xf0] }
  0xaa   :  { %664 = vmatpush.bf16.msrb.mxu0 %v3522_v8  ;;  %v373_v3 = vpop.f32.mrf.mxu0  ;;  %v652_v8 = vld [vmem:[%s5097_s0 + $0xa0] sm:$0xff]  ;;  %v3272_v4 = vld [vmem:[%s5098_s3 + $0x110] sm:$0xf0] }
  0xab   :  { %677 = vmatpush.bf16.msrb.mxu1 %v3527_v9  ;;  %v386_v5 = vpop.f32.mrf.mxu1  ;;  %v2488_v3 = vld [vmem:[%s5098_s3 + $0x30] sm:$0xf] }
  0xac   :  { %690 = vmatpush.bf16.msrb.mxu2 %v3534_v10  ;;  %v653_v10 = vld [vmem:[%s5097_s0 + $0xa8] sm:$0xff]  ;;  %v4048_v5 = vld [vmem:[%s5099_s2] sm:$0x1f] }
  0xad   :  { %703 = vmatpush.bf16.msrb.mxu3 %v3539_v11  ;;  %v2740_v11 = vld [vmem:[%s5098_s3 + $0x228] sm:$0xf] }
  0xae   :  { %665 = vmatpush.bf16.msrb.mxu0 %v3546_v12  ;;  %v399_v9 = vpop.f32.mrf.mxu2  ;;  %v3308_v12 = vld [vmem:[%s5098_s3 + $0x230] sm:$0xf0] }
  0xaf   :  { %678 = vmatpush.bf16.msrb.mxu1 %v3551_v13  ;;  %v2549_v13 = vor.u32 %v3260_v7, %v2548_v6  ;;  %v2596_v6 = vld [vmem:[%s5098_s3 + $0x108] sm:$0xf]  ;;  %v2693_v7 = vor.u32 %v3296_v55, %v2692_v54  ;;  %v3293_v9 = vld [vmem:[%s5098_s3 + $0x1b8] sm:$0xf0]  ;;  %v2812_v55 = vld [vmem:[%s5098_s3 + $0x2b8] sm:$0xf] }
  0xb0   :  { %691 = vmatpush.bf16.msrb.mxu2 %v3558_v14  ;;  %v2536_v14 = vld [vmem:[%s5098_s3 + $0x90] sm:$0xf] }
  0xb1   :  { %704 = vmatpush.bf16.msrb.mxu3 %v3563_v15  ;;  %v3257_v15 = vld [vmem:[%s5098_s3 + $0x98] sm:$0xf0] }
  0xb2   :  { %666 = vmatpush.bf16.msrb.mxu0 %v3570_v16  ;;  %v657_v16 = vpack.c.bf16 %v652_v8, %v652_v8  ;;  %v2680_v8 = vld [vmem:[%s5098_s3 + $0x1b0] sm:$0xf] }
  0xb3   :  { %679 = vmatpush.bf16.msrb.mxu1 %v3575_v17  ;;  %v412_v17 = vpop.f32.mrf.mxu3 }
  0xb4   :  { %692 = vmatpush.bf16.msrb.mxu2 %v3582_v18  ;;  %v2644_v18 = vld [vmem:[%s5098_s3 + $0x168] sm:$0xf]  ;;  %v2584_v17 = vld [vmem:[%s5098_s3 + $0xf0] sm:$0xf] }
  0xb5   :  { %705 = vmatpush.bf16.msrb.mxu3 %v3587_v19  ;;  %v3284_v19 = vld [vmem:[%s5098_s3 + $0x170] sm:$0xf0] }
  0xb6   :  { %667 = vmatpush.bf16.msrb.mxu0 %v3594_v20  ;;  %v655_v20 = vld [vmem:[%s5097_s0 + $0xb8] sm:$0xff] }
  0xb7   :  { %680 = vmatpush.bf16.msrb.mxu1 %v3599_v21  ;;  %v658_v21 = vpack.c.bf16 %v653_v10, %v653_v10  ;;  %v660_v56 = vpack.c.bf16 %v655_v20, %v655_v20 }
  0xb8   :  { %693 = vmatpush.bf16.msrb.mxu2 %v3606_v22  ;;  %v2741_v22 = vor.u32 %v3308_v12, %v2740_v11 }
  0xb9   :  { %706 = vmatpush.bf16.msrb.mxu3 %v3611_v23  ;;  %v2728_v23 = vld [vmem:[%s5098_s3 + $0x210] sm:$0xf] }
  0xba   :  { %668 = vmatpush.bf16.msrb.mxu0 %v3618_v24  ;;  %v3305_v24 = vld [vmem:[%s5098_s3 + $0x218] sm:$0xf0] }
  0xbb   :  { %681 = vmatpush.bf16.msrb.mxu1 %v3623_v25  ;;  %v2537_v25 = vor.u32 %v3257_v15, %v2536_v14  ;;  %v2729_v58 = vor.u32 %v3305_v24, %v2728_v23  ;;  %v2597_v14 = vor.u32 %v3272_v4, %v2596_v6  ;;  %v3242_v15 = vld [vmem:[%s5098_s3 + $0x20] sm:$0xf0]  ;;  %v3277_v6 = vld [vmem:[%s5098_s3 + $0x13c] sm:$0xf]  ;;  %v2622_v4 = vld [vmem:[%s5098_s3 + $0x144] sm:$0xf0] }
  0xbc   :  { %694 = vmatpush.bf16.msrb.mxu2 %v3630_v26  ;;  %v2632_v26 = vld [vmem:[%s5098_s3 + $0x150] sm:$0xf]  ;;  %v3290_v23 = vld [vmem:[%s5098_s3 + $0x1a0] sm:$0xf0] }
  0xbd   :  { %707 = vmatpush.bf16.msrb.mxu3 %v3635_v27  ;;  %v654_v27 = vld [vmem:[%s5097_s0 + $0xb0] sm:$0xff]  ;;  %v2633_v63 = vor.u32 %v3281_v57, %v2632_v26  ;;  %v2836_v26 = vld [vmem:[%s5098_s3 + $0x2e8] sm:$0xf] }
  0xbe   :  { %669 = vmatpush.bf16.msrb.mxu0 %v3642_v28  ;;  %v2645_v28 = vor.u32 %v3284_v19, %v2644_v18  ;;  %v659_v59 = vpack.c.bf16 %v654_v27, %v654_v27  ;;  %v423_v41 = vpop.f32.mrf.mxu0  ;;  %v3269_v18 = vld [vmem:[%s5098_s3 + $0xf8] sm:$0xf0]  ;;  %v3332_v57 = vld [vmem:[%s5098_s3 + $0x2f0] sm:$0xf0] }
  0xbf   :  { %682 = vmatpush.bf16.msrb.mxu1 %v3647_v29  ;;  %v2524_v29 = vld [vmem:[%s5098_s3 + $0x78] sm:$0xf]  ;;  %v4029_v52 = vpop.f32.mrf.mxu1  ;;  %v424_v12 = vadd.f32 %v423_v41, %v411_v1  ;;  %v2585_v27 = vor.u32 %v3269_v18, %v2584_v17  ;;  %v3259_v41 = vld [vmem:[%s5098_s3 + $0xac] sm:$0xf]  ;;  %v730_v17 = vperm.slane %v4048_v5, 1 }
  0xc0   :  { %695 = vmatpush.bf16.msrb.mxu2 %v3657_v31  ;;  %v3278_v31 = vld [vmem:[%s5098_s3 + $0x140] sm:$0xf0] }
  0xc1   :  { %670 = vmatmul.bf16.vlgmr.msrb.gmra.mxu0 %v657_v16  ;;  %708 = vmatpush.bf16.msrb.mxu3 %v3673_v35  ;;  %v3302_v35 = vld [vmem:[%s5098_s3 + $0x200] sm:$0xf0]  ;;  %v2621_v48 = vor.u32 %v3278_v31, %v2620_v33  ;;  %v2560_v33 = vld [vmem:[%s5098_s3 + $0xc0] sm:$0xf] }
  0xc2   :  { %714 = vmatpush.bf16.msra.mxu0 %v3662_v32  ;;  %v3254_v32 = vld [vmem:[%s5098_s3 + $0x80] sm:$0xf0]  ;;  %683 = vmatmul.bf16.vlgmr.msrb.gmra.mxu1 %v658_v21  ;;  %v2717_v34 = vor.u32 %v3302_v35, %v2716_v60  ;;  %v2681_v21 = vor.u32 %v3293_v9, %v2680_v8  ;;  %v3287_v60 = vld [vmem:[%s5098_s3 + $0x188] sm:$0xf0] }
  0xc3   :  { %1562 = vmatpush.bf16.msra.mxu1 %v2549_v13  ;;  %v2525_v61 = vor.u32 %v3254_v32, %v2524_v29  ;;  %696 = vmatmul.bf16.vlgmr.msrb.gmra.mxu2 %v659_v59  ;;  %v729_v13 = vperm.slane %v4048_v5, 0  ;;  %v2572_v29 = vld [vmem:[%s5098_s3 + $0xd8] sm:$0xf]  ;;  %v3266_v32 = vld [vmem:[%s5098_s3 + $0xe0] sm:$0xf0] }
  0xc4   :  { %1575 = vmatpush.bf16.msra.mxu2 %v2645_v28  ;;  %709 = vmatmul.bf16.vlgmr.msrb.gmra.mxu3 %v660_v56  ;;  %v2464_v28 = vld [vmem:[%s5098_s3] sm:$0xf]  ;;  %v3323_v9 = vld [vmem:[%s5098_s3 + $0x2a8] sm:$0xf0] }
  0xc5   :  { %1588 = vmatpush.bf16.msra.mxu3 %v2741_v22  ;;  %v2668_v22 = vld [vmem:[%s5098_s3 + $0x198] sm:$0xf]  ;;  %v2656_v59 = vld [vmem:[%s5098_s3 + $0x180] sm:$0xf] }
  0xc6   :  { %715 = vmatpush.bf16.msra.mxu0 %v3685_v39  ;;  %v2512_v39 = vld [vmem:[%s5098_s3 + $0x60] sm:$0xf]  ;;  %v4063_v11 = vpop.f32.mrf.mxu2  ;;  %v425_v16 = vpop.f32.mrf.mxu0  ;;  %v2669_v56 = vor.u32 %v3290_v23, %v2668_v22  ;;  %v2657_v36 = vor.u32 %v3287_v60, %v2656_v59  ;;  %v2514_v22 = vld [vmem:[%s5098_s3 + $0x6c] sm:$0xf0]  ;;  %v3317_v60 = vld [vmem:[%s5098_s3 + $0x278] sm:$0xf0] }
  0xc7   :  { %1563 = vmatpush.bf16.msra.mxu1 %v2537_v25  ;;  %v2513_v38 = vor.u32 %v3251_v30, %v2512_v39  ;;  %v448_v19 = vpop.f32.mrf.mxu1  ;;  %v4078_v20 = vpop.f32.mrf.mxu3  ;;  %v739_v25 = vadd.f32 %v729_v13, %v424_v12  ;;  %v2573_v30 = vor.u32 %v3266_v32, %v2572_v29  ;;  %v460_v1 = vadd.f32 %v4063_v11, %v4029_v52  ;;  %v3253_v11 = vld [vmem:[%s5098_s3 + $0x7c] sm:$0xf]  ;;  %v2526_v12 = vld [vmem:[%s5098_s3 + $0x84] sm:$0xf0]  ;;  %v2776_v59 = vld [vmem:[%s5098_s3 + $0x270] sm:$0xf] }
  0xc8   :  { %1576 = vmatpush.bf16.msra.mxu2 %v2633_v63  ;;  %v2837_v63 = vor.u32 %v3332_v57, %v2836_v26  ;;  %v2625_v13 = vor.u32 %v3277_v6, %v2622_v4  ;;  %v2529_v18 = vor.u32 %v3253_v11, %v2526_v12  ;;  %v3250_v19 = vld [vmem:[%s5098_s3 + $0x64] sm:$0xf]  ;;  %v2502_v57 = vld [vmem:[%s5098_s3 + $0x54] sm:$0xf0]  ;;  %v3304_v12 = vld [vmem:[%s5098_s3 + $0x214] sm:$0xf] }
  0xc9   :  { %1589 = vmatpush.bf16.msra.mxu3 %v2729_v58  ;;  %v656_v58 = vld [vmem:[%s5097_s0 + $0xc0] sm:$0xff]  ;;  %v744_v39 = vmax.f32 %v739_v25, 0.0  ;;  %v3320_v25 = vld [vmem:[%s5098_s3 + $0x290] sm:$0xf0]  ;;  %v2517_v32 = vor.u32 %v3250_v19, %v2514_v22  ;;  %v2742_v6 = vld [vmem:[%s5098_s3 + $0x234] sm:$0xf0] }
  0xca   :  { %716 = vmatpush.bf16.msra.mxu0 %v3695_v42  ;;  %v2500_v42 = vld [vmem:[%s5098_s3 + $0x48] sm:$0xf]  ;;  %v661_v31 = vpack.c.bf16 %v656_v58, %v656_v58  ;;  %v2706_v19 = vld [vmem:[%s5098_s3 + $0x1ec] sm:$0xf0]  ;;  %v3295_v22 = vld [vmem:[%s5098_s3 + $0x1cc] sm:$0xf] }
  0xcb   :  { %1564 = vmatpush.bf16.msra.mxu1 %v2525_v61  ;;  %v2501_v0 = vor.u32 %v3248_v49, %v2500_v42  ;;  %v3280_v49 = vld [vmem:[%s5098_s3 + $0x154] sm:$0xf]  ;;  %v4146_v51 = vpack.c.bf16 %v744_v39, %v744_v39 }
  0xcc   :  { %1577 = vmatpush.bf16.msra.mxu2 %v2621_v48  ;;  %v2550_v48 = vld [vmem:[%s5098_s3 + $0xb4] sm:$0xf0]  ;;  %v3244_v39 = vld [vmem:[%s5098_s3 + $0x34] sm:$0xf] }
  0xcd   :  { %1590 = vmatpush.bf16.msra.mxu3 %v2717_v34  ;;  %v3263_v34 = vld [vmem:[%s5098_s3 + $0xc8] sm:$0xf0]  ;;  %v2553_v54 = vor.u32 %v3259_v41, %v2550_v48  ;;  %v3265_v48 = vld [vmem:[%s5098_s3 + $0xdc] sm:$0xf] }
  0xce   :  { %717 = vmatpush.bf16.msra.mxu0 %v3704_v43  ;;  %v3245_v43 = vld [vmem:[%s5098_s3 + $0x38] sm:$0xf0]  ;;  %v461_v61 = vpop.f32.mrf.mxu2 }
  0xcf   :  { %1565 = vmatpush.bf16.msra.mxu1 %v2513_v38  ;;  %v2489_v10 = vor.u32 %v3245_v43, %v2488_v3  ;;  %v474_v37 = vpop.f32.mrf.mxu3  ;;  %v2824_v38 = vld [vmem:[%s5098_s3 + $0x2d0] sm:$0xf]  ;;  %v2538_v3 = vld [vmem:[%s5098_s3 + $0x9c] sm:$0xf0]  ;;  %v2637_v43 = vor.u32 %v3280_v49, %v2634_v50 }
  0xd0   :  { %1578 = vmatpush.bf16.msra.mxu2 %v2609_v2  ;;  %v3256_v2 = vld [vmem:[%s5098_s3 + $0x94] sm:$0xf]  ;;  %v2586_v61 = vld [vmem:[%s5098_s3 + $0xfc] sm:$0xf0] }
  0xd1   :  { %1591 = vmatpush.bf16.msra.mxu3 %v2705_v53  ;;  %v2561_v53 = vor.u32 %v3263_v34, %v2560_v33  ;;  %v2541_v8 = vor.u32 %v3256_v2, %v2538_v3  ;;  %v2490_v34 = vld [vmem:[%s5098_s3 + $0x3c] sm:$0xf0]  ;;  %v2562_v2 = vld [vmem:[%s5098_s3 + $0xcc] sm:$0xf0] }
  0xd2   :  { %718 = vmatpush.bf16.msra.mxu0 %v3713_v44  ;;  %v2476_v44 = vld [vmem:[%s5098_s3 + $0x18] sm:$0xf]  ;;  %v2493_v50 = vor.u32 %v3244_v39, %v2490_v34  ;;  %v3261_v39 = vld [vmem:[%s5098_s3 + $0xb8] sm:$0xf0] }
  0xd3   :  { %1566 = vmatpush.bf16.msra.mxu1 %v2501_v0  ;;  %v2477_v24 = vor.u32 %v3242_v15, %v2476_v44  ;;  %v3326_v0 = vld [vmem:[%s5098_s3 + $0x2c0] sm:$0xf0]  ;;  %v2610_v44 = vld [vmem:[%s5098_s3 + $0x12c] sm:$0xf0] }
  0xd4   :  { %1579 = vmatpush.bf16.msra.mxu2 %v2597_v14  ;;  %v2813_v52 = vor.u32 %v3326_v0, %v2812_v55  ;;  %v3274_v14 = vld [vmem:[%s5098_s3 + $0x124] sm:$0xf]  ;;  %v2752_v0 = vld [vmem:[%s5098_s3 + $0x240] sm:$0xf] }
  0xd5   :  { %1592 = vmatpush.bf16.msra.mxu3 %v2693_v7  ;;  %v2800_v7 = vld [vmem:[%s5098_s3 + $0x2a0] sm:$0xf]  ;;  %v2613_v23 = vor.u32 %v3274_v14, %v2610_v44  ;;  %v3262_v55 = vld [vmem:[%s5098_s3 + $0xc4] sm:$0xf] }
  0xd6   :  { %719 = vmatpush.bf16.msra.mxu0 %v3722_v45  ;;  %v3239_v45 = vld [vmem:[%s5098_s3 + $0x8] sm:$0xf0]  ;;  %v2801_v15 = vor.u32 %v3323_v9, %v2800_v7  ;;  %v2466_v9 = vld [vmem:[%s5098_s3 + $0xc] sm:$0xf0] }
  0xd7   :  { %1567 = vmatpush.bf16.msra.mxu1 %v2489_v10  ;;  %v2465_v35 = vor.u32 %v3239_v45, %v2464_v28  ;;  %v473_v10 = vadd.f32 %v4078_v20, %v460_v1  ;;  %v2598_v28 = vld [vmem:[%s5098_s3 + $0x114] sm:$0xf0]  ;;  %v3311_v1 = vld [vmem:[%s5098_s3 + $0x248] sm:$0xf0] }
  0xd8   :  { %1580 = vmatpush.bf16.msra.mxu2 %v2585_v27  ;;  %v3271_v27 = vld [vmem:[%s5098_s3 + $0x10c] sm:$0xf]  ;;  %v2753_v3 = vor.u32 %v3311_v1, %v2752_v0  ;;  %v3350_v0 = vld [vmem:[%s5098_s3 + $0x380] sm:$0xf0] }
  0xd9   :  { %1593 = vmatpush.bf16.msra.mxu3 %v2681_v21  ;;  %v2601_v58 = vor.u32 %v3271_v27, %v2598_v28 }
  0xda   :  { %720 = vmatpush.bf16.msra.mxu0 %v3731_v46  ;;  %v2646_v46 = vld [vmem:[%s5098_s3 + $0x174] sm:$0xf0] }
  0xdb   :  { %1568 = vmatpush.bf16.msra.mxu1 %v2477_v24  ;;  %v2649_v42 = vor.u32 %v3283_v62, %v2646_v46  ;;  %v2788_v24 = vld [vmem:[%s5098_s3 + $0x288] sm:$0xf]  ;;  %v2777_v62 = vor.u32 %v3317_v60, %v2776_v59 }
  0xdc   :  { %1581 = vmatpush.bf16.msra.mxu2 %v2573_v30  ;;  %v2789_v45 = vor.u32 %v3320_v25, %v2788_v24 }
  0xdd   :  { %1594 = vmatpush.bf16.msra.mxu3 %v2669_v56  ;;  %v3247_v56 = vld [vmem:[%s5098_s3 + $0x4c] sm:$0xf] }
  0xde   :  { %721 = vmatpush.bf16.msra.mxu0 %v3740_v47  ;;  %v2825_v47 = vor.u32 %v3329_v40, %v2824_v38  ;;  %v485_v16 = vpop.f32.mrf.mxu0  ;;  %v2764_v38 = vld [vmem:[%s5098_s3 + $0x258] sm:$0xf]  ;;  %v3314_v40 = vld [vmem:[%s5098_s3 + $0x260] sm:$0xf0] }
  0xdf   :  { %1569 = vmatpush.bf16.msra.mxu1 %v2465_v35  ;;  %v486_v20 = vadd.f32 %v485_v16, %v473_v10  ;;  %v498_v21 = vpop.f32.mrf.mxu1  ;;  %v3268_v35 = vld [vmem:[%s5098_s3 + $0xf4] sm:$0xf]  ;;  %v2765_v49 = vor.u32 %v3314_v40, %v2764_v38  ;;  %v2565_v10 = vor.u32 %v3262_v55, %v2562_v2  ;;  %v2718_v16 = vld [vmem:[%s5098_s3 + $0x204] sm:$0xf0]  ;;  %v2908_v55 = vld [vmem:[%s5098_s3 + $0x378] sm:$0xf] }
  0xe0   :  { %1582 = vmatpush.bf16.msra.mxu2 %v2561_v53  ;;  %v2589_v37 = vor.u32 %v3268_v35, %v2586_v61  ;;  %v2478_v53 = vld [vmem:[%s5098_s3 + $0x24] sm:$0xf0]  ;;  %v2556_v61 = vld [vmem:[%s5098_s3 + $0xb0] sm:$0xf]  ;;  %v2909_v2 = vor.u32 %v3350_v0, %v2908_v55 }
  0xe1   :  { %722 = vmatmul.bf16.vlgmr.msra.gmra.mxu0 %v661_v31  ;;  %1595 = vmatpush.bf16.msra.mxu3 %v2657_v36  ;;  %v499_v29 = vadd.f32 %v498_v21, %v486_v20 }
  0xe2   :  { %1601 = vmatpush.bf16.msrb.mxu0 %v2837_v63  ;;  %1570 = vmatmul.bf16.vlgmr.msra.gmra.mxu1 %v4146_v51  ;;  %v2505_v63 = vor.u32 %v3247_v56, %v2502_v57  ;;  %v731_v56 = vperm.slane %v4048_v5, 2  ;;  %v2932_v57 = vld [vmem:[%s5098_s3 + $0x3a8] sm:$0xf] }
  0xe3   :  { %v740_v26 = vadd.f32 %v730_v17, %v499_v29  ;;  %v3292_v29 = vld [vmem:[%s5098_s3 + $0x1b4] sm:$0xf] }
  0xe4   :  { %1627 = vmatpush.bf16.msrb.mxu2 %v2553_v54 }
  0xe5   :  { %1640 = vmatpush.bf16.msrb.mxu3 %v2649_v42  ;;  %v745_v46 = vmax.f32 %v740_v26, 0.0  ;;  %v2574_v42 = vld [vmem:[%s5098_s3 + $0xe4] sm:$0xf0] }
  0xe6   :  { %1602 = vmatpush.bf16.msrb.mxu0 %v2825_v47  ;;  %v521_v30 = vpop.f32.mrf.mxu2  ;;  %v487_v33 = vpop.f32.mrf.mxu0  ;;  %v3241_v47 = vld [vmem:[%s5098_s3 + $0x1c] sm:$0xf]  ;;  %v2577_v54 = vor.u32 %v3265_v48, %v2574_v42  ;;  %v2557_v48 = vor.u32 %v3261_v39, %v2556_v61  ;;  %v2544_v42 = vld [vmem:[%s5098_s3 + $0x98] sm:$0xf]  ;;  %v3346_v61 = vld [vmem:[%s5098_s3 + $0x364] sm:$0xf] }
  0xe7   :  { %v4228_v31 = vpack.c.bf16 %v745_v46, %v745_v46  ;;  %v500_v36 = vpop.f32.mrf.mxu1  ;;  %v534_v41 = vpop.f32.mrf.mxu3  ;;  %v2670_v46 = vld [vmem:[%s5098_s3 + $0x1a4] sm:$0xf0]  ;;  %v2848_v39 = vld [vmem:[%s5098_s3 + $0x300] sm:$0xf] }
  0xe8   :  { %1628 = vmatpush.bf16.msrb.mxu2 %v2541_v8  ;;  %v3238_v8 = vld [vmem:[%s5098_s3 + $0x4] sm:$0xf]  ;;  %v535_v21 = vadd.f32 %v534_v41, %v521_v30  ;;  %v2920_v36 = vld [vmem:[%s5098_s3 + $0x390] sm:$0xf] }
  0xe9   :  { %1641 = vmatpush.bf16.msrb.mxu3 %v2637_v43  ;;  %1583 = vmatmul.bf16.vlgmr.msra.gmra.mxu2 %v4228_v31  ;;  %v3307_v43 = vld [vmem:[%s5098_s3 + $0x22c] sm:$0xf]  ;;  %v2469_v44 = vor.u32 %v3238_v8, %v2466_v9 }
  0xea   :  { %1603 = vmatpush.bf16.msrb.mxu0 %v2813_v52  ;;  %v2745_v4 = vor.u32 %v3307_v43, %v2742_v6  ;;  %v2481_v52 = vor.u32 %v3241_v47, %v2478_v53  ;;  %v3258_v53 = vld [vmem:[%s5098_s3 + $0xa0] sm:$0xf0]  ;;  %v2896_v43 = vld [vmem:[%s5098_s3 + $0x360] sm:$0xf]  ;;  %v3347_v6 = vld [vmem:[%s5098_s3 + $0x368] sm:$0xf0] }
  0xeb   :  { %v2897_v8 = vor.u32 %v3347_v6, %v2896_v43  ;;  %v3355_v9 = vld [vmem:[%s5098_s3 + $0x3ac] sm:$0xf]  ;;  %v2940_v43 = vld [vmem:[%s5098_s3 + $0x3b0] sm:$0xf]  ;;  %v3357_v6 = vld [vmem:[%s5098_s3 + $0x3b8] sm:$0xf0] }
  0xec   :  { %1629 = vmatpush.bf16.msrb.mxu2 %v2529_v18  ;;  %v3298_v18 = vld [vmem:[%s5098_s3 + $0x1e4] sm:$0xf] }
  0xed   :  { %1642 = vmatpush.bf16.msrb.mxu3 %v2625_v13  ;;  %v2730_v13 = vld [vmem:[%s5098_s3 + $0x21c] sm:$0xf0]  ;;  %v2709_v20 = vor.u32 %v3298_v18, %v2706_v19 }
  0xee   :  { %1604 = vmatpush.bf16.msrb.mxu0 %v2801_v15  ;;  %v523_v7 = vpop.f32.mrf.mxu2  ;;  %v2733_v14 = vor.u32 %v3304_v12, %v2730_v13  ;;  %v3301_v15 = vld [vmem:[%s5098_s3 + $0x1fc] sm:$0xf]  ;;  %v2884_v13 = vld [vmem:[%s5098_s3 + $0x348] sm:$0xf]  ;;  %v2922_v18 = vld [vmem:[%s5098_s3 + $0x39c] sm:$0xf0] }
  0xef   :  { %v536_v11 = vpop.f32.mrf.mxu3  ;;  %v2721_v17 = vor.u32 %v3301_v15, %v2718_v16  ;;  %v3252_v15 = vld [vmem:[%s5098_s3 + $0x70] sm:$0xf0] }
  0xf0   :  { %1630 = vmatpush.bf16.msrb.mxu2 %v2517_v32  ;;  %v2682_v32 = vld [vmem:[%s5098_s3 + $0x1bc] sm:$0xf0] }
  0xf1   :  { %1643 = vmatpush.bf16.msrb.mxu3 %v2613_v23  ;;  %v2694_v23 = vld [vmem:[%s5098_s3 + $0x1d4] sm:$0xf0]  ;;  %v2685_v26 = vor.u32 %v3292_v29, %v2682_v32 }
  0xf2   :  { %1605 = vmatpush.bf16.msrb.mxu0 %v2789_v45  ;;  %v2697_v27 = vor.u32 %v3295_v22, %v2694_v23  ;;  %v3341_v22 = vld [vmem:[%s5098_s3 + $0x338] sm:$0xf0]  ;;  %v2508_v23 = vld [vmem:[%s5098_s3 + $0x50] sm:$0xf]  ;;  %v2496_v32 = vld [vmem:[%s5098_s3 + $0x38] sm:$0xf] }
  0xf4   :  { %1631 = vmatpush.bf16.msrb.mxu2 %v2505_v63 }
  0xf5   :  { %1644 = vmatpush.bf16.msrb.mxu3 %v2601_v58  ;;  %v3356_v58 = vld [vmem:[%s5098_s3 + $0x3b0] sm:$0xf0] }
  0xf6   :  { %1606 = vmatpush.bf16.msrb.mxu0 %v2777_v62  ;;  %v2933_v60 = vor.u32 %v3356_v58, %v2932_v57  ;;  %v3289_v62 = vld [vmem:[%s5098_s3 + $0x19c] sm:$0xf]  ;;  %v2860_v57 = vld [vmem:[%s5098_s3 + $0x318] sm:$0xf]  ;;  %v3338_v58 = vld [vmem:[%s5098_s3 + $0x320] sm:$0xf0] }
  0xf7   :  { %v2673_v34 = vor.u32 %v3289_v62, %v2670_v46  ;;  %v2898_v62 = vld [vmem:[%s5098_s3 + $0x36c] sm:$0xf0] }
  0xf8   :  { %1632 = vmatpush.bf16.msrb.mxu2 %v2493_v50  ;;  %1614 = vmatpush.bf16.msrb.mxu1 %v2933_v60  ;;  %v2658_v50 = vld [vmem:[%s5098_s3 + $0x18c] sm:$0xf0]  ;;  %v2901_v46 = vor.u32 %v3346_v61, %v2898_v62 }
  0xf9   :  { %1645 = vmatpush.bf16.msrb.mxu3 %v2589_v37  ;;  %v3353_v37 = vld [vmem:[%s5098_s3 + $0x398] sm:$0xf0]  ;;  %v2850_v62 = vld [vmem:[%s5098_s3 + $0x30c] sm:$0xf0] }
  0xfa   :  { %1607 = vmatpush.bf16.msrb.mxu0 %v2765_v49  ;;  %v2921_v40 = vor.u32 %v3353_v37, %v2920_v36  ;;  %v3286_v49 = vld [vmem:[%s5098_s3 + $0x184] sm:$0xf]  ;;  %v3243_v36 = vld [vmem:[%s5098_s3 + $0x28] sm:$0xf0] }
  0xfc   :  { %1633 = vmatpush.bf16.msrb.mxu2 %v2481_v52  ;;  %1615 = vmatpush.bf16.msrb.mxu1 %v2921_v40  ;;  %v3255_v52 = vld [vmem:[%s5098_s3 + $0x88] sm:$0xf0]  ;;  %v2838_v40 = vld [vmem:[%s5098_s3 + $0x2f4] sm:$0xf0] }
  0xfd   :  { %1646 = vmatpush.bf16.msrb.mxu3 %v2577_v54  ;;  %v2661_v54 = vor.u32 %v3286_v49, %v2658_v50  ;;  %v732_v50 = vperm.slane %v4048_v5, 3 }
  0xfe   :  { %1608 = vmatpush.bf16.msrb.mxu0 %v2753_v3  ;;  %v547_v24 = vpop.f32.mrf.mxu0  ;;  %v2545_v3 = vor.u32 %v3258_v53, %v2544_v42  ;;  %v2886_v42 = vld [vmem:[%s5098_s3 + $0x354] sm:$0xf0] }
  0xff   :  { %v560_v25 = vpop.f32.mrf.mxu1  ;;  %v548_v28 = vadd.f32 %v547_v24, %v535_v21  ;;  %v2872_v21 = vld [vmem:[%s5098_s3 + $0x330] sm:$0xf]  ;;  %v3249_v24 = vld [vmem:[%s5098_s3 + $0x58] sm:$0xf0] }
 0x100   :  { %1634 = vmatpush.bf16.msrb.mxu2 %v2469_v44  ;;  %1616 = vmatpush.bf16.msrb.mxu1 %v2909_v2  ;;  %v2520_v44 = vld [vmem:[%s5098_s3 + $0x68] sm:$0xf]  ;;  %v2509_v29 = vor.u32 %v3249_v24, %v2508_v23  ;;  %v3240_v2 = vld [vmem:[%s5098_s3 + $0x10] sm:$0xf0] }
 0x101   :  { %1647 = vmatpush.bf16.msrb.mxu3 %v2565_v10  ;;  %v561_v45 = vadd.f32 %v560_v25, %v548_v28  ;;  %v2934_v10 = vld [vmem:[%s5098_s3 + $0x3b4] sm:$0xf0]  ;;  %v2873_v25 = vor.u32 %v3341_v22, %v2872_v21  ;;  %v2910_v28 = vld [vmem:[%s5098_s3 + $0x384] sm:$0xf0]  ;;  %v3337_v21 = vld [vmem:[%s5098_s3 + $0x31c] sm:$0xf] }
 0x102   :  { %1653 = vmatpush.bf16.msra.mxu0 %v2745_v4  ;;  %v2532_v4 = vld [vmem:[%s5098_s3 + $0x80] sm:$0xf]  ;;  %v2937_v11 = vor.u32 %v3355_v9, %v2934_v10  ;;  %v2862_v24 = vld [vmem:[%s5098_s3 + $0x324] sm:$0xf0] }
 0x103   :  { %1635 = vmatmul.bf16.vlgmr.msrb.gmra.mxu2 %v4146_v51  ;;  %v2533_v12 = vor.u32 %v3255_v52, %v2532_v4  ;;  %v3328_v52 = vld [vmem:[%s5098_s3 + $0x2d4] sm:$0xf] }
 0x104   :  { %1617 = vmatpush.bf16.msrb.mxu1 %v2897_v8  ;;  %1679 = vmatpush.bf16.msra.mxu2 %v2937_v11  ;;  %v3340_v8 = vld [vmem:[%s5098_s3 + $0x334] sm:$0xf]  ;;  %v2874_v11 = vld [vmem:[%s5098_s3 + $0x33c] sm:$0xf0] }
 0x106   :  { %1654 = vmatpush.bf16.msra.mxu0 %v2733_v14  ;;  %v573_v59 = vpop.f32.mrf.mxu2  ;;  %v549_v33 = vpop.f32.mrf.mxu0  ;;  %v3344_v14 = vld [vmem:[%s5098_s3 + $0x350] sm:$0xf0] }
 0x107   :  { %v574_v35 = vadd.f32 %v573_v59, %v561_v45  ;;  %v4326_v30 = vpop.f32.mrf.mxu3  ;;  %v562_v38 = vpop.f32.mrf.mxu1  ;;  %v2885_v16 = vor.u32 %v3344_v14, %v2884_v13  ;;  %v2652_v13 = vld [vmem:[%s5098_s3 + $0x170] sm:$0xf]  ;;  %v2877_v14 = vor.u32 %v3340_v8, %v2874_v11 }
 0x108   :  { %v3331_v38 = vld [vmem:[%s5098_s3 + $0x2ec] sm:$0xf] }
 0x109   :  { %v741_v63 = vadd.f32 %v731_v56, %v574_v35  ;;  %1618 = vmatpush.bf16.msrb.mxu1 %v2885_v16  ;;  %v2861_v35 = vor.u32 %v3338_v58, %v2860_v57  ;;  %v2941_v16 = vor.u32 %v3357_v6, %v2940_v43  ;;  %v2916_v57 = vld [vmem:[%s5098_s3 + $0x380] sm:$0xf]  ;;  %v3351_v58 = vld [vmem:[%s5098_s3 + $0x388] sm:$0xf0] }
 0x10a   :  { %1655 = vmatpush.bf16.msra.mxu0 %v2721_v17  ;;  %v3352_v17 = vld [vmem:[%s5098_s3 + $0x394] sm:$0xf]  ;;  %v2778_v43 = vld [vmem:[%s5098_s3 + $0x27c] sm:$0xf0] }
 0x10b   :  { %v746_v41 = vmax.f32 %v741_v63, 0.0  ;;  %v2925_v19 = vor.u32 %v3352_v17, %v2922_v18  ;;  %v2928_v17 = vld [vmem:[%s5098_s3 + $0x398] sm:$0xf]  ;;  %v3354_v18 = vld [vmem:[%s5098_s3 + $0x3a0] sm:$0xf0] }
 0x10d   :  { %v4343_v47 = vpack.c.bf16 %v746_v41, %v746_v41  ;;  %1680 = vmatpush.bf16.msra.mxu2 %v2925_v19  ;;  %1619 = vmatpush.bf16.msrb.mxu1 %v2873_v25  ;;  %v3343_v41 = vld [vmem:[%s5098_s3 + $0x34c] sm:$0xf]  ;;  %v3325_v19 = vld [vmem:[%s5098_s3 + $0x2bc] sm:$0xf] }
 0x10e   :  { %1656 = vmatpush.bf16.msra.mxu0 %v2709_v20  ;;  %v575_v1 = vpop.f32.mrf.mxu2  ;;  %v2521_v20 = vor.u32 %v3252_v15, %v2520_v44  ;;  %v2889_v55 = vor.u32 %v3343_v41, %v2886_v42  ;;  %v3285_v15 = vld [vmem:[%s5098_s3 + $0x178] sm:$0xf0]  ;;  %v3330_v41 = vld [vmem:[%s5098_s3 + $0x2e0] sm:$0xf0]  ;;  %v3348_v42 = vld [vmem:[%s5098_s3 + $0x370] sm:$0xf0] }
 0x10f   :  { %1596 = vmatmul.bf16.vlgmr.msra.gmra.mxu3 %v4343_v47  ;;  %v598_v7 = vpop.f32.mrf.mxu3  ;;  %v2653_v25 = vor.u32 %v3285_v15, %v2652_v13  ;;  %v2766_v15 = vld [vmem:[%s5098_s3 + $0x264] sm:$0xf0] }
 0x110   :  { %1692 = vmatpush.bf16.msra.mxu3 %v2557_v48  ;;  %v2841_v48 = vor.u32 %v3331_v38, %v2838_v40  ;;  %v2826_v7 = vld [vmem:[%s5098_s3 + $0x2dc] sm:$0xf0]  ;;  %v2790_v38 = vld [vmem:[%s5098_s3 + $0x294] sm:$0xf0] }
 0x111   :  { %1620 = vmatpush.bf16.msrb.mxu1 %v2861_v35  ;;  %v2829_v10 = vor.u32 %v3328_v52, %v2826_v7  ;;  %v3334_v35 = vld [vmem:[%s5098_s3 + $0x304] sm:$0xf]  ;;  %v2832_v40 = vld [vmem:[%s5098_s3 + $0x2d8] sm:$0xf]  ;;  %v3327_v52 = vld [vmem:[%s5098_s3 + $0x2c8] sm:$0xf0] }
 0x112   :  { %1657 = vmatpush.bf16.msra.mxu0 %v2697_v27  ;;  %v3349_v27 = vld [vmem:[%s5098_s3 + $0x37c] sm:$0xf] }
 0x113   :  { %v2913_v45 = vor.u32 %v3349_v27, %v2910_v28  ;;  %v2640_v27 = vld [vmem:[%s5098_s3 + $0x158] sm:$0xf] }
 0x114   :  { %1693 = vmatpush.bf16.msra.mxu3 %v2545_v3 }
 0x115   :  { %1681 = vmatpush.bf16.msra.mxu2 %v2913_v45  ;;  %v2865_v45 = vor.u32 %v3337_v21, %v2862_v24 }
 0x116   :  { %1658 = vmatpush.bf16.msra.mxu0 %v2685_v26  ;;  %v3246_v26 = vld [vmem:[%s5098_s3 + $0x40] sm:$0xf0] }
 0x117   :  { %v2497_v63 = vor.u32 %v3246_v26, %v2496_v32  ;;  %v3282_v32 = vld [vmem:[%s5098_s3 + $0x160] sm:$0xf0]  ;;  %v2929_v26 = vor.u32 %v3354_v18, %v2928_v17  ;;  %v2808_v18 = vld [vmem:[%s5098_s3 + $0x2a8] sm:$0xf] }
 0x118   :  { %1694 = vmatpush.bf16.msra.mxu3 %v2533_v12 }
 0x119   :  { %1682 = vmatpush.bf16.msra.mxu2 %v2901_v46  ;;  %v2844_v46 = vld [vmem:[%s5098_s3 + $0x2f0] sm:$0xf] }
 0x11a   :  { %1659 = vmatpush.bf16.msra.mxu0 %v2673_v34  ;;  %v2484_v34 = vld [vmem:[%s5098_s3 + $0x20] sm:$0xf] }
 0x11b   :  { %v2485_v53 = vor.u32 %v3243_v36, %v2484_v34  ;;  %v3319_v36 = vld [vmem:[%s5098_s3 + $0x28c] sm:$0xf] }
 0x11c   :  { %1695 = vmatpush.bf16.msra.mxu3 %v2521_v20  ;;  %v2814_v20 = vld [vmem:[%s5098_s3 + $0x2c4] sm:$0xf0] }
 0x11d   :  { %1683 = vmatpush.bf16.msra.mxu2 %v2889_v55  ;;  %v2817_v23 = vor.u32 %v3325_v19, %v2814_v20  ;;  %v3276_v55 = vld [vmem:[%s5098_s3 + $0x130] sm:$0xf0] }
 0x11e   :  { %1660 = vmatpush.bf16.msra.mxu0 %v2661_v54  ;;  %v609_v56 = vpop.f32.mrf.mxu0  ;;  %v2472_v54 = vld [vmem:[%s5098_s3 + $0x8] sm:$0xf]  ;;  %v3324_v19 = vld [vmem:[%s5098_s3 + $0x2b0] sm:$0xf0] }
 0x11f   :  { %v610_v59 = vadd.f32 %v609_v56, %v4326_v30  ;;  %v622_v60 = vpop.f32.mrf.mxu1  ;;  %1648 = vmatmul.bf16.vlgmr.msrb.gmra.mxu3 %v4228_v31  ;;  %v3335_v30 = vld [vmem:[%s5098_s3 + $0x308] sm:$0xf0]  ;;  %v2473_v12 = vor.u32 %v3240_v2, %v2472_v54  ;;  %v2616_v54 = vld [vmem:[%s5098_s3 + $0x128] sm:$0xf]  ;;  %v3345_v2 = vld [vmem:[%s5098_s3 + $0x358] sm:$0xf0]  ;;  %v2809_v21 = vor.u32 %v3324_v19, %v2808_v18 }
 0x120   :  { %1696 = vmatpush.bf16.msra.mxu3 %v2509_v29  ;;  %v2849_v37 = vor.u32 %v3335_v30, %v2848_v39  ;;  %v2641_v39 = vor.u32 %v3282_v32, %v2640_v27  ;;  %v2628_v30 = vld [vmem:[%s5098_s3 + $0x140] sm:$0xf]  ;;  %v2617_v7 = vor.u32 %v3276_v55, %v2616_v54  ;;  %v3339_v27 = vld [vmem:[%s5098_s3 + $0x328] sm:$0xf0]  ;;  %v2712_v18 = vld [vmem:[%s5098_s3 + $0x1e8] sm:$0xf] }
 0x121   :  { %v623_v33 = vadd.f32 %v622_v60, %v610_v59  ;;  %1684 = vmatpush.bf16.msra.mxu2 %v2877_v14  ;;  %v3322_v59 = vld [vmem:[%s5098_s3 + $0x2a4] sm:$0xf]  ;;  %v2802_v60 = vld [vmem:[%s5098_s3 + $0x2ac] sm:$0xf0]  ;;  %v3300_v19 = vld [vmem:[%s5098_s3 + $0x1f0] sm:$0xf0] }
 0x122   :  { %1621 = vmatpush.bf16.msrb.mxu1 %v2849_v37  ;;  %v2805_v61 = vor.u32 %v3322_v59, %v2802_v60  ;;  %v2917_v37 = vor.u32 %v3351_v58, %v2916_v57  ;;  %v3342_v14 = vld [vmem:[%s5098_s3 + $0x340] sm:$0xf0]  ;;  %v3321_v57 = vld [vmem:[%s5098_s3 + $0x298] sm:$0xf0]  ;;  %v2580_v58 = vld [vmem:[%s5098_s3 + $0xe0] sm:$0xf] }
 0x123   :  { %v3267_v59 = vld [vmem:[%s5098_s3 + $0xe8] sm:$0xf0] }
 0x124   :  { %1697 = vmatpush.bf16.msra.mxu3 %v2497_v63  ;;  %v3333_v63 = vld [vmem:[%s5098_s3 + $0x2f8] sm:$0xf0] }
 0x125   :  { %1685 = vmatpush.bf16.msra.mxu2 %v2865_v45  ;;  %v2845_v34 = vor.u32 %v3333_v63, %v2844_v46  ;;  %v2754_v45 = vld [vmem:[%s5098_s3 + $0x24c] sm:$0xf0]  ;;  %v3336_v46 = vld [vmem:[%s5098_s3 + $0x310] sm:$0xf0] }
 0x126   :  { %v635_v49 = vpop.f32.mrf.mxu2  ;;  %v611_v3 = vpop.f32.mrf.mxu0  ;;  %1666 = vmatpush.bf16.msra.mxu1 %v2841_v48  ;;  %v2904_v48 = vld [vmem:[%s5098_s3 + $0x368] sm:$0xf] }
 0x127   :  { %v636_v0 = vadd.f32 %v635_v49, %v623_v33  ;;  %v648_v1 = vpop.f32.mrf.mxu3  ;;  %v624_v4 = vpop.f32.mrf.mxu1  ;;  %v2853_v33 = vor.u32 %v3334_v35, %v2850_v62  ;;  %v2793_v49 = vor.u32 %v3319_v36, %v2790_v38  ;;  %v3316_v3 = vld [vmem:[%s5098_s3 + $0x274] sm:$0xf]  ;;  %v2856_v62 = vld [vmem:[%s5098_s3 + $0x308] sm:$0xf] }
 0x128   :  { %1698 = vmatpush.bf16.msra.mxu3 %v2485_v53  ;;  %v2781_v6 = vor.u32 %v3316_v3, %v2778_v43  ;;  %v2820_v4 = vld [vmem:[%s5098_s3 + $0x2c0] sm:$0xf]  ;;  %v2568_v36 = vld [vmem:[%s5098_s3 + $0xc8] sm:$0xf]  ;;  %v2857_v38 = vor.u32 %v3336_v46, %v2856_v62  ;;  %v733_v43 = vperm.slane %v4048_v5, 4 }
 0x129   :  { %v649_v9 = vadd.f32 %v648_v1, %v636_v0  ;;  %1686 = vmatpush.bf16.msra.mxu2 %v2853_v33  ;;  %v2905_v0 = vor.u32 %v3348_v42, %v2904_v48  ;;  %v2892_v1 = vld [vmem:[%s5098_s3 + $0x350] sm:$0xf]  ;;  %v2821_v8 = vor.u32 %v3327_v52, %v2820_v4  ;;  %v3315_v48 = vld [vmem:[%s5098_s3 + $0x268] sm:$0xf0]  ;;  %v3306_v5 = vld [vmem:[%s5098_s3 + $0x220] sm:$0xf0] }
 0x12a   :  { %1667 = vmatpush.bf16.msra.mxu1 %v2829_v10  ;;  %v3273_v10 = vld [vmem:[%s5098_s3 + $0x118] sm:$0xf0]  ;;  %v2893_v11 = vor.u32 %v3345_v2, %v2892_v1 }
 0x12b   :  { %v742_v44 = vadd.f32 %v732_v50, %v649_v9  ;;  %v2833_v50 = vor.u32 %v3330_v41, %v2832_v40  ;;  %v2604_v9 = vld [vmem:[%s5098_s3 + $0x110] sm:$0xf]  ;;  %v2772_v41 = vld [vmem:[%s5098_s3 + $0x260] sm:$0xf] }
 0x12c   :  { %1699 = vmatpush.bf16.msra.mxu3 %v2473_v12  ;;  %v2880_v12 = vld [vmem:[%s5098_s3 + $0x338] sm:$0xf]  ;;  %v2605_v20 = vor.u32 %v3273_v10, %v2604_v9  ;;  %v3309_v9 = vld [vmem:[%s5098_s3 + $0x238] sm:$0xf0] }
 0x12d   :  { %v747_v22 = vmax.f32 %v742_v44, 0.0  ;;  %1731 = vmatpush.bf16.msrb.mxu2 %v2845_v34  ;;  %v3313_v44 = vld [vmem:[%s5098_s3 + $0x25c] sm:$0xf]  ;;  %v2881_v24 = vor.u32 %v3342_v14, %v2880_v12  ;;  %v2736_v12 = vld [vmem:[%s5098_s3 + $0x218] sm:$0xf] }
 0x12e   :  { %v637_v28 = vpop.f32.mrf.mxu2  ;;  %1668 = vmatpush.bf16.msra.mxu1 %v2817_v23  ;;  %v2769_v17 = vor.u32 %v3313_v44, %v2766_v15  ;;  %v3270_v23 = vld [vmem:[%s5098_s3 + $0x100] sm:$0xf0]  ;;  %v2737_v44 = vor.u32 %v3306_v5, %v2736_v12  ;;  %v2724_v15 = vld [vmem:[%s5098_s3 + $0x200] sm:$0xf]  ;;  %v2986_v12 = vld [vmem:[%s5101_s5 + $0x58] sm:$0xf0] }
 0x12f   :  { %v4505_v29 = vpack.c.bf16 %v747_v22, %v747_v22  ;;  %v650_v56 = vpop.f32.mrf.mxu3  ;;  %1700 = vmatmul.bf16.vlgmr.msra.gmra.mxu3 %v4146_v51  ;;  %v3279_v51 = vld [vmem:[%s5098_s3 + $0x148] sm:$0xf0]  ;;  %v2592_v22 = vld [vmem:[%s5098_s3 + $0xf8] sm:$0xf]  ;;  %v3310_v28 = vld [vmem:[%s5098_s3 + $0x244] sm:$0xf] }
 0x130   :  { %1744 = vmatpush.bf16.msrb.mxu3 %v2941_v16  ;;  %v2629_v53 = vor.u32 %v3279_v51, %v2628_v30  ;;  %v2757_v32 = vor.u32 %v3310_v28, %v2754_v45  ;;  %v2796_v56 = vld [vmem:[%s5098_s3 + $0x290] sm:$0xf]  ;;  %v3318_v30 = vld [vmem:[%s5098_s3 + $0x280] sm:$0xf0]  ;;  %v2581_v51 = vor.u32 %v3267_v59, %v2580_v58  ;;  %v3291_v58 = vld [vmem:[%s5098_s3 + $0x1a8] sm:$0xf0] }
 0x131   :  { %1609 = vmatmul.bf16.vlgmr.msrb.gmra.mxu0 %v4505_v29  ;;  %1732 = vmatpush.bf16.msrb.mxu2 %v2833_v50  ;;  %v2797_v35 = vor.u32 %v3321_v57, %v2796_v56  ;;  %v2760_v50 = vld [vmem:[%s5098_s3 + $0x248] sm:$0xf]  ;;  %v3294_v28 = vld [vmem:[%s5098_s3 + $0x1c0] sm:$0xf0]  ;;  %v2676_v57 = vld [vmem:[%s5098_s3 + $0x1a0] sm:$0xf] }
 0x132   :  { %1705 = vmatpush.bf16.msrb.mxu0 %v2653_v25  ;;  %1669 = vmatpush.bf16.msra.mxu1 %v2805_v61  ;;  %v2868_v25 = vld [vmem:[%s5098_s3 + $0x320] sm:$0xf]  ;;  %v2677_v59 = vor.u32 %v3291_v58, %v2676_v57 }
 0x133   :  { %v2869_v60 = vor.u32 %v3339_v27, %v2868_v25  ;;  %v2688_v27 = vld [vmem:[%s5098_s3 + $0x1b8] sm:$0xf] }
 0x134   :  { %1745 = vmatpush.bf16.msrb.mxu3 %v2929_v26  ;;  %v2593_v26 = vor.u32 %v3270_v23, %v2592_v22  ;;  %v2700_v22 = vld [vmem:[%s5098_s3 + $0x1d0] sm:$0xf]  ;;  %v3297_v23 = vld [vmem:[%s5098_s3 + $0x1d8] sm:$0xf0] }
 0x135   :  { %1733 = vmatpush.bf16.msrb.mxu2 %v2821_v8  ;;  %v2748_v8 = vld [vmem:[%s5098_s3 + $0x230] sm:$0xf]  ;;  %v2701_v25 = vor.u32 %v3297_v23, %v2700_v22  ;;  %v3361_v23 = vld [vmem:[%s5101_s5 + $0x14] sm:$0xf0] }
 0x136   :  { %1706 = vmatpush.bf16.msrb.mxu0 %v2641_v39  ;;  %1670 = vmatpush.bf16.msra.mxu1 %v2793_v49  ;;  %v2784_v39 = vld [vmem:[%s5098_s3 + $0x278] sm:$0xf]  ;;  %v2773_v49 = vor.u32 %v3315_v48, %v2772_v41  ;;  %v2952_v22 = vld [vmem:[%s5101_s5 + $0x10] sm:$0xf] }
 0x137   :  { %v2785_v34 = vor.u32 %v3318_v30, %v2784_v39  ;;  %v3000_v30 = vld [vmem:[%s5101_s5 + $0x70] sm:$0xf]  ;;  %v3369_v41 = vld [vmem:[%s5101_s5 + $0x54] sm:$0xf0] }
 0x138   :  { %1746 = vmatpush.bf16.msrb.mxu3 %v2917_v37  ;;  %v3264_v37 = vld [vmem:[%s5098_s3 + $0xd0] sm:$0xf0] }
 0x139   :  { %1734 = vmatpush.bf16.msrb.mxu2 %v2809_v21  ;;  %v2569_v42 = vor.u32 %v3264_v37, %v2568_v36  ;;  %v2713_v21 = vor.u32 %v3300_v19, %v2712_v18  ;;  %v3371_v36 = vld [vmem:[%s5101_s5 + $0x64] sm:$0xf0]  ;;  %v3366_v18 = vld [vmem:[%s5101_s5 + $0x44] sm:$0xf] }
 0x13a   :  { %1707 = vmatpush.bf16.msrb.mxu0 %v2629_v53  ;;  %1671 = vmatpush.bf16.msra.mxu1 %v2781_v6  ;;  %v3312_v53 = vld [vmem:[%s5098_s3 + $0x250] sm:$0xf0] }
 0x13b   :  { %v2761_v55 = vor.u32 %v3312_v53, %v2760_v50  ;;  %v3372_v53 = vld [vmem:[%s5101_s5 + $0x74] sm:$0xf] }
 0x13c   :  { %1747 = vmatpush.bf16.msrb.mxu3 %v2905_v0 }
 0x13d   :  { %1735 = vmatpush.bf16.msrb.mxu2 %v2797_v35 }
 0x13e   :  { %v4593_v13 = vpop.f32.mrf.mxu0  ;;  %1708 = vmatpush.bf16.msrb.mxu0 %v2617_v7  ;;  %1672 = vmatpush.bf16.msra.mxu1 %v2769_v17 }
 0x13f   :  { %v684_v16 = vpop.f32.mrf.mxu1 }
 0x140   :  { %1748 = vmatpush.bf16.msrb.mxu3 %v2893_v11  ;;  %v685_v0 = vadd.f32 %v684_v16, %v4593_v13  ;;  %v2749_v11 = vor.u32 %v3309_v9, %v2748_v8  ;;  %v3303_v16 = vld [vmem:[%s5098_s3 + $0x208] sm:$0xf0]  ;;  %v3064_v9 = vld [vmem:[%s5101_s5 + $0xf0] sm:$0xf] }
 0x141   :  { %1661 = vmatmul.bf16.vlgmr.msra.gmra.mxu0 %v4343_v47  ;;  %1736 = vmatpush.bf16.msrb.mxu2 %v2785_v34  ;;  %v2725_v17 = vor.u32 %v3303_v16, %v2724_v15  ;;  %v3056_v16 = vld [vmem:[%s5101_s5 + $0xe0] sm:$0xf] }
 0x142   :  { %1709 = vmatpush.bf16.msrb.mxu0 %v2605_v20  ;;  %1673 = vmatpush.bf16.msra.mxu1 %v2757_v32  ;;  %v4701_v20 = vld [vmem:[%s5100_s4] sm:$0x7] }
 0x143   :  { %v917_v37 = vperm.slane %v4701_v20, 1 }
 0x144   :  { %1749 = vmatpush.bf16.msrb.mxu3 %v2881_v24  ;;  %v916_v24 = vperm.slane %v4701_v20, 0 }
 0x145   :  { %1737 = vmatpush.bf16.msrb.mxu2 %v2773_v49 }
 0x146   :  { %v673_v61 = vpop.f32.mrf.mxu0  ;;  %1710 = vmatpush.bf16.msrb.mxu0 %v2593_v26  ;;  %v697_v40 = vpop.f32.mrf.mxu2  ;;  %v2689_v26 = vor.u32 %v3294_v28, %v2688_v27  ;;  %v3048_v28 = vld [vmem:[%s5101_s5 + $0xd0] sm:$0xf] }
 0x147   :  { %v686_v63 = vpop.f32.mrf.mxu1  ;;  %v710_v33 = vpop.f32.mrf.mxu3  ;;  %v698_v2 = vadd.f32 %v697_v40, %v685_v0  ;;  %v2984_v40 = vld [vmem:[%s5101_s5 + $0x50] sm:$0xf]  ;;  %v2976_v0 = vld [vmem:[%s5101_s5 + $0x40] sm:$0xf] }
 0x148   :  { %1750 = vmatpush.bf16.msrb.mxu3 %v2869_v60  ;;  %v2664_v60 = vld [vmem:[%s5098_s3 + $0x188] sm:$0xf]  ;;  %v2985_v48 = vor.u32 %v3369_v41, %v2984_v40 }
 0x149   :  { %1738 = vmatpush.bf16.msrb.mxu2 %v2761_v55  ;;  %v711_v3 = vadd.f32 %v710_v33, %v698_v2  ;;  %v3370_v2 = vld [vmem:[%s5101_s5 + $0x64] sm:$0xf] }
 0x14a   :  { %1711 = vmatpush.bf16.msrb.mxu0 %v2581_v51  ;;  %v3373_v51 = vld [vmem:[%s5101_s5 + $0x74] sm:$0xf0] }
 0x14b   :  { %v3001_v33 = vor.u32 %v3373_v51, %v3000_v30  ;;  %v3362_v51 = vld [vmem:[%s5101_s5 + $0x24] sm:$0xf] }
 0x14c   :  { %1751 = vmatpush.bf16.msrb.mxu3 %v2857_v38 }
 0x14e   :  { %1712 = vmatpush.bf16.msrb.mxu0 %v2569_v42  ;;  %v699_v1 = vpop.f32.mrf.mxu2 }
 0x14f   :  { %v712_v54 = vpop.f32.mrf.mxu3  ;;  %v3367_v1 = vld [vmem:[%s5101_s5 + $0x44] sm:$0xf0] }
 0x150   :  { %v3002_v54 = vld [vmem:[%s5101_s5 + $0x78] sm:$0xf0] }
 0x151   :  { %1713 = vmatmul.bf16.vlgmr.msrb.gmra.mxu0 %v4228_v31  ;;  %v3005_v55 = vor.u32 %v3372_v53, %v3002_v54 }
 0x152   :  { %2057 = vmatpush.bf16.msra.mxu0 %v3001_v33  ;;  %v2962_v33 = vld [vmem:[%s5101_s5 + $0x28] sm:$0xf0] }
 0x153   :  { %2096 = vmatpush.bf16.msra.mxu3 %v3005_v55  ;;  %v3384_v55 = vld [vmem:[%s5101_s5 + $0xd4] sm:$0xf] }
 0x15e   :  { %v723_v6 = vpop.f32.mrf.mxu0 }
 0x15f   :  { %v724_v4 = vadd.f32 %v723_v6, %v711_v3  ;;  %v1571_v52 = vpop.f32.mrf.mxu1  ;;  %v2977_v3 = vor.u32 %v3367_v1, %v2976_v0  ;;  %v2968_v6 = vld [vmem:[%s5101_s5 + $0x30] sm:$0xf]  ;;  %v3050_v0 = vld [vmem:[%s5101_s5 + $0xd8] sm:$0xf0] }
 0x160   :  { %v1572_v45 = vadd.f32 %v1571_v52, %v916_v24  ;;  %v3053_v1 = vor.u32 %v3384_v55, %v3050_v0  ;;  %v3397_v55 = vld [vmem:[%s5101_s5 + $0x134] sm:$0xf0]  ;;  %v3396_v0 = vld [vmem:[%s5101_s5 + $0x134] sm:$0xf] }
 0x161   :  { %v743_v7 = vadd.f32 %v733_v43, %v724_v4  ;;  %v2994_v43 = vld [vmem:[%s5101_s5 + $0x68] sm:$0xf0]  ;;  %v3365_v4 = vld [vmem:[%s5101_s5 + $0x34] sm:$0xf0] }
 0x162   :  { %v2997_v52 = vor.u32 %v3370_v2, %v2994_v43  ;;  %v3024_v2 = vld [vmem:[%s5101_s5 + $0xa0] sm:$0xf] }
 0x163   :  { %v748_v10 = vmax.f32 %v743_v7, 0.0  ;;  %v2969_v7 = vor.u32 %v3365_v4, %v2968_v6  ;;  %v3358_v6 = vld [vmem:[%s5101_s5 + $0x4] sm:$0xf]  ;;  %v2946_v4 = vld [vmem:[%s5101_s5 + $0x8] sm:$0xf0] }
 0x164   :  { %2097 = vmatpush.bf16.msra.mxu3 %v2997_v52  ;;  %v2949_v52 = vor.u32 %v3358_v6, %v2946_v4  ;;  %v3395_v6 = vld [vmem:[%s5101_s5 + $0x124] sm:$0xf0]  ;;  %v3394_v4 = vld [vmem:[%s5101_s5 + $0x124] sm:$0xf] }
 0x165   :  { %v753_v31 = vpack.c.bf16 %v748_v10, %v748_v10  ;;  %v3389_v10 = vld [vmem:[%s5101_s5 + $0xf4] sm:$0xf0] }
 0x166   :  { %v725_v13 = vpop.f32.mrf.mxu0 }
 0x167   :  { %v1573_v14 = vpop.f32.mrf.mxu1  ;;  %1622 = vmatmul.bf16.vlgmr.msrb.gmra.mxu1 %v753_v31  ;;  %1687 = vmatmul.bf16.vlgmr.msra.gmra.mxu2 %v753_v31 }
 0x168   :  { %1752 = vmatmul.bf16.vlgmr.msrb.gmra.mxu3 %v753_v31  ;;  %1718 = vmatpush.bf16.msrb.mxu1 %v2749_v11  ;;  %v3065_v11 = vor.u32 %v3389_v10, %v3064_v9  ;;  %v3368_v31 = vld [vmem:[%s5101_s5 + $0x54] sm:$0xf]  ;;  %v2960_v14 = vld [vmem:[%s5101_s5 + $0x20] sm:$0xf]  ;;  %v3016_v10 = vld [vmem:[%s5101_s5 + $0x90] sm:$0xf] }
 0x169   :  { %v2989_v13 = vor.u32 %v3368_v31, %v2986_v12 }
 0x16b   :  { %2098 = vmatpush.bf16.msra.mxu3 %v2989_v13  ;;  %v3380_v13 = vld [vmem:[%s5101_s5 + $0xb4] sm:$0xf] }
 0x16c   :  { %1719 = vmatpush.bf16.msrb.mxu1 %v2737_v44  ;;  %v1584_v32 = vpop.f32.mrf.mxu2  ;;  %v3363_v44 = vld [vmem:[%s5101_s5 + $0x24] sm:$0xf0] }
 0x16d   :  { %v1585_v56 = vadd.f32 %v1584_v32, %v1572_v45  ;;  %v2961_v15 = vor.u32 %v3363_v44, %v2960_v14  ;;  %v3385_v45 = vld [vmem:[%s5101_s5 + $0xd4] sm:$0xf0]  ;;  %v3034_v14 = vld [vmem:[%s5101_s5 + $0xb8] sm:$0xf0]  ;;  %v3008_v44 = vld [vmem:[%s5101_s5 + $0x80] sm:$0xf] }
 0x16e   :  { %v3049_v32 = vor.u32 %v3385_v45, %v3048_v28  ;;  %v3026_v28 = vld [vmem:[%s5101_s5 + $0xa8] sm:$0xf0] }
 0x170   :  { %1720 = vmatpush.bf16.msrb.mxu1 %v2725_v17  ;;  %v3387_v17 = vld [vmem:[%s5101_s5 + $0xe4] sm:$0xf0] }
 0x171   :  { %v3057_v19 = vor.u32 %v3387_v17, %v3056_v16  ;;  %v3375_v16 = vld [vmem:[%s5101_s5 + $0x84] sm:$0xf0]  ;;  %v3128_v17 = vld [vmem:[%s5101_s5 + $0x170] sm:$0xf] }
 0x174   :  { %1721 = vmatpush.bf16.msrb.mxu1 %v2713_v21  ;;  %v1586_v35 = vpop.f32.mrf.mxu2  ;;  %v2978_v21 = vld [vmem:[%s5101_s5 + $0x48] sm:$0xf0] }
 0x175   :  { %v2981_v24 = vor.u32 %v3366_v18, %v2978_v21  ;;  %v3405_v18 = vld [vmem:[%s5101_s5 + $0x174] sm:$0xf0] }
 0x176   :  { %v3129_v21 = vor.u32 %v3405_v18, %v3128_v17  ;;  %v3072_v17 = vld [vmem:[%s5101_s5 + $0x100] sm:$0xf]  ;;  %v3391_v18 = vld [vmem:[%s5101_s5 + $0x104] sm:$0xf0] }
 0x177   :  { %1674 = vmatmul.bf16.vlgmr.msra.gmra.mxu1 %v4505_v29  ;;  %1739 = vmatmul.bf16.vlgmr.msrb.gmra.mxu2 %v4505_v29  ;;  %v3288_v29 = vld [vmem:[%s5098_s3 + $0x190] sm:$0xf0] }
 0x178   :  { %1722 = vmatpush.bf16.msrb.mxu1 %v2701_v25  ;;  %v2665_v61 = vor.u32 %v3288_v29, %v2664_v60  ;;  %v2953_v25 = vor.u32 %v3361_v23, %v2952_v22  ;;  %2099 = vmatpush.bf16.msra.mxu3 %v2981_v24  ;;  %v3359_v60 = vld [vmem:[%s5101_s5 + $0x4] sm:$0xf0]  ;;  %v3388_v29 = vld [vmem:[%s5101_s5 + $0xf4] sm:$0xf]  ;;  %v3130_v23 = vld [vmem:[%s5101_s5 + $0x178] sm:$0xf0] }
 0x179   :  { %v3404_v22 = vld [vmem:[%s5101_s5 + $0x174] sm:$0xf]  ;;  %2083 = vmatpush.bf16.msra.mxu2 %v3129_v21 }
 0x17a   :  { %v3133_v24 = vor.u32 %v3404_v22, %v3130_v23  ;;  %v3073_v22 = vor.u32 %v3391_v18, %v3072_v17  ;;  %v3074_v23 = vld [vmem:[%s5101_s5 + $0x108] sm:$0xf0] }
 0x17c   :  { %1723 = vmatpush.bf16.msrb.mxu1 %v2689_v26  ;;  %v2970_v26 = vld [vmem:[%s5101_s5 + $0x38] sm:$0xf0] }
 0x180   :  { %1724 = vmatpush.bf16.msrb.mxu1 %v2677_v59  ;;  %v2944_v59 = vld [vmem:[%s5101_s5] sm:$0xf] }
 0x181   :  { %v2945_v35 = vor.u32 %v3359_v60, %v2944_v59  ;;  %v3122_v59 = vld [vmem:[%s5101_s5 + $0x168] sm:$0xf0] }
 0x184   :  { %1725 = vmatpush.bf16.msrb.mxu1 %v2665_v61  ;;  %v3066_v61 = vld [vmem:[%s5101_s5 + $0xf8] sm:$0xf0] }
 0x186   :  { %v1636_v62 = vpop.f32.mrf.mxu2 }
 0x187   :  { %1726 = vmatmul.bf16.vlgmr.msrb.gmra.mxu1 %v4343_v47  ;;  %v2992_v47 = vld [vmem:[%s5101_s5 + $0x60] sm:$0xf]  ;;  %v1637_v42 = vadd.f32 %v1636_v62, %v917_v37  ;;  %v3032_v37 = vld [vmem:[%s5101_s5 + $0xb0] sm:$0xf] }
 0x188   :  { %v2993_v38 = vor.u32 %v3371_v36, %v2992_v47  ;;  %2070 = vmatpush.bf16.msra.mxu1 %v3065_v11  ;;  %v3040_v62 = vld [vmem:[%s5101_s5 + $0xc0] sm:$0xf]  ;;  %v2965_v47 = vor.u32 %v3362_v51, %v2962_v33  ;;  %v3058_v36 = vld [vmem:[%s5101_s5 + $0xe8] sm:$0xf0]  ;;  %v3377_v11 = vld [vmem:[%s5101_s5 + $0x94] sm:$0xf0] }
 0x189   :  { %v3017_v31 = vor.u32 %v3377_v11, %v3016_v10  ;;  %v3114_v51 = vld [vmem:[%s5101_s5 + $0x158] sm:$0xf0] }
 0x18a   :  { %2058 = vmatpush.bf16.msra.mxu0 %v2993_v38  ;;  %v3381_v38 = vld [vmem:[%s5101_s5 + $0xb4] sm:$0xf0] }
 0x18b   :  { %v3033_v41 = vor.u32 %v3381_v38, %v3032_v37  ;;  %v3104_v37 = vld [vmem:[%s5101_s5 + $0x140] sm:$0xf]  ;;  %v3399_v38 = vld [vmem:[%s5101_s5 + $0x144] sm:$0xf0] }
 0x18c   :  { %2071 = vmatpush.bf16.msra.mxu1 %v3057_v19  ;;  %v3009_v19 = vor.u32 %v3375_v16, %v3008_v44 }
 0x18e   :  { %v1638_v46 = vpop.f32.mrf.mxu2  ;;  %2059 = vmatpush.bf16.msra.mxu0 %v2985_v48 }
 0x18f   :  { %v3383_v46 = vld [vmem:[%s5101_s5 + $0xc4] sm:$0xf0] }
 0x190   :  { %2072 = vmatpush.bf16.msra.mxu1 %v3049_v32  ;;  %v3041_v30 = vor.u32 %v3383_v46, %v3040_v62  ;;  %v3120_v32 = vld [vmem:[%s5101_s5 + $0x160] sm:$0xf]  ;;  %v3112_v62 = vld [vmem:[%s5101_s5 + $0x150] sm:$0xf]  ;;  %v3401_v46 = vld [vmem:[%s5101_s5 + $0x154] sm:$0xf0] }
 0x192   :  { %v1597_v63 = vpop.f32.mrf.mxu3  ;;  %2060 = vmatpush.bf16.msra.mxu0 %v2977_v3  ;;  %v3379_v3 = vld [vmem:[%s5101_s5 + $0xa4] sm:$0xf0] }
 0x193   :  { %v4731_v39 = vadd.f32 %v1597_v63, %v1585_v56  ;;  %v3364_v56 = vld [vmem:[%s5101_s5 + $0x34] sm:$0xf]  ;;  %v3069_v63 = vor.u32 %v3388_v29, %v3066_v61  ;;  %v3025_v43 = vor.u32 %v3379_v3, %v3024_v2  ;;  %v3098_v2 = vld [vmem:[%s5101_s5 + $0x138] sm:$0xf0] }
 0x194   :  { %v2973_v58 = vor.u32 %v3364_v56, %v2970_v26  ;;  %2073 = vmatpush.bf16.msra.mxu1 %v3041_v30  ;;  %v3403_v56 = vld [vmem:[%s5101_s5 + $0x164] sm:$0xf0]  ;;  %v3402_v26 = vld [vmem:[%s5101_s5 + $0x164] sm:$0xf]  ;;  %v3376_v29 = vld [vmem:[%s5101_s5 + $0x94] sm:$0xf]  ;;  %v3113_v30 = vor.u32 %v3401_v46, %v3112_v62  ;;  %v3101_v3 = vor.u32 %v3396_v0, %v3098_v2 }
 0x195   :  { %v3125_v60 = vor.u32 %v3402_v26, %v3122_v59  ;;  %v3408_v0 = vld [vmem:[%s5102_s7 + $0x10] sm:$0xff]  ;;  %v3414_v2 = vld [vmem:[%s5102_s7 + $0x40] sm:$0xff] }
 0x196   :  { %2061 = vmatpush.bf16.msra.mxu0 %v2969_v7  ;;  %2100 = vmatpush.bf16.msra.mxu3 %v2973_v58  ;;  %v3382_v7 = vld [vmem:[%s5101_s5 + $0xc4] sm:$0xf]  ;;  %v3121_v58 = vor.u32 %v3403_v56, %v3120_v32 }
 0x198   :  { %2074 = vmatpush.bf16.msra.mxu1 %v3033_v41  ;;  %2084 = vmatpush.bf16.msra.mxu2 %v3121_v58 }
 0x19a   :  { %v1599_v34 = vpop.f32.mrf.mxu3  ;;  %2062 = vmatpush.bf16.msra.mxu0 %v2961_v15  ;;  %2101 = vmatpush.bf16.msra.mxu3 %v2965_v47  ;;  %v3037_v15 = vor.u32 %v3380_v13, %v3034_v14  ;;  %v3010_v47 = vld [vmem:[%s5101_s5 + $0x88] sm:$0xf0]  ;;  %v3082_v14 = vld [vmem:[%s5101_s5 + $0x118] sm:$0xf0] }
 0x19b   :  { %v3386_v34 = vld [vmem:[%s5101_s5 + $0xe4] sm:$0xf] }
 0x19c   :  { %v3061_v40 = vor.u32 %v3386_v34, %v3058_v36  ;;  %2075 = vmatpush.bf16.msra.mxu1 %v3025_v43  ;;  %v3374_v34 = vld [vmem:[%s5101_s5 + $0x84] sm:$0xf]  ;;  %2085 = vmatpush.bf16.msra.mxu2 %v3113_v30  ;;  %v3088_v43 = vld [vmem:[%s5101_s5 + $0x120] sm:$0xf] }
 0x19d   :  { %v3013_v36 = vor.u32 %v3374_v34, %v3010_v47 }
 0x19e   :  { %2063 = vmatpush.bf16.msra.mxu0 %v2953_v25  ;;  %v3378_v25 = vld [vmem:[%s5101_s5 + $0xa4] sm:$0xf] }
 0x19f   :  { %v3029_v45 = vor.u32 %v3378_v25, %v3026_v28 }
 0x1a0   :  { %2076 = vmatpush.bf16.msra.mxu1 %v3017_v31  ;;  %v3080_v31 = vld [vmem:[%s5101_s5 + $0x110] sm:$0xf] }
 0x1a2   :  { %v1649_v49 = vpop.f32.mrf.mxu3  ;;  %2064 = vmatpush.bf16.msra.mxu0 %v2945_v35  ;;  %v3018_v35 = vld [vmem:[%s5101_s5 + $0x98] sm:$0xf0] }
 0x1a3   :  { %v4752_v50 = vadd.f32 %v1649_v49, %v1637_v42  ;;  %v3360_v42 = vld [vmem:[%s5101_s5 + $0x14] sm:$0xf]  ;;  %v2954_v49 = vld [vmem:[%s5101_s5 + $0x18] sm:$0xf0]  ;;  %v3021_v61 = vor.u32 %v3376_v29, %v3018_v35 }
 0x1a4   :  { %v2957_v54 = vor.u32 %v3360_v42, %v2954_v49  ;;  %2077 = vmatpush.bf16.msra.mxu1 %v3009_v19  ;;  %v3106_v42 = vld [vmem:[%s5101_s5 + $0x148] sm:$0xf0]  ;;  %v3390_v19 = vld [vmem:[%s5101_s5 + $0x104] sm:$0xf] }
 0x1a5   :  { %v3077_v25 = vor.u32 %v3390_v19, %v3074_v23 }
 0x1a6   :  { %2109 = vmatpush.bf16.msrb.mxu0 %v3069_v63  ;;  %2102 = vmatpush.bf16.msra.mxu3 %v2957_v54  ;;  %v3400_v63 = vld [vmem:[%s5101_s5 + $0x154] sm:$0xf]  ;;  %v3096_v54 = vld [vmem:[%s5101_s5 + $0x130] sm:$0xf] }
 0x1a7   :  { %v3117_v33 = vor.u32 %v3400_v63, %v3114_v51 }
 0x1a8   :  { %2122 = vmatpush.bf16.msrb.mxu1 %v3133_v24 }
 0x1aa   :  { %v1651_v8 = vpop.f32.mrf.mxu3  ;;  %2110 = vmatpush.bf16.msrb.mxu0 %v3061_v40  ;;  %2103 = vmatpush.bf16.msra.mxu3 %v2949_v52  ;;  %v3398_v40 = vld [vmem:[%s5101_s5 + $0x144] sm:$0xf] }
 0x1ab   :  { %v3042_v8 = vld [vmem:[%s5101_s5 + $0xc8] sm:$0xf0]  ;;  %v3109_v49 = vor.u32 %v3398_v40, %v3106_v42  ;;  %v3416_v42 = vld [vmem:[%s5102_s7 + $0x50] sm:$0xff] }
 0x1ac   :  { %v3045_v9 = vor.u32 %v3382_v7, %v3042_v8  ;;  %2123 = vmatpush.bf16.msrb.mxu1 %v3125_v60  ;;  %v3089_v7 = vor.u32 %v3395_v6, %v3088_v43  ;;  %v3090_v8 = vld [vmem:[%s5101_s5 + $0x128] sm:$0xf0]  ;;  %v3406_v6 = vld [vmem:[%s5102_s7] sm:$0xff] }
 0x1ad   :  { %v3093_v10 = vor.u32 %v3394_v4, %v3090_v8  ;;  %v3411_v40 = vld [vmem:[%s5102_s7 + $0x28] sm:$0xff] }
 0x1ae   :  { %v4790_v5 = vpop.f32.mrf.mxu0  ;;  %2111 = vmatpush.bf16.msrb.mxu0 %v3053_v1  ;;  %v3097_v1 = vor.u32 %v3397_v55, %v3096_v54  ;;  %v3415_v55 = vld [vmem:[%s5102_s7 + $0x48] sm:$0xff] }
 0x1af   :  { %v1611_v52 = vadd.f32 %v4790_v5, %v4731_v39  ;;  %v3392_v39 = vld [vmem:[%s5101_s5 + $0x114] sm:$0xf]  ;;  %v3407_v43 = vld [vmem:[%s5102_s7 + $0x8] sm:$0xff] }
 0x1b0   :  { %2124 = vmatpush.bf16.msrb.mxu1 %v3117_v33  ;;  %v3085_v44 = vor.u32 %v3392_v39, %v3082_v14 }
 0x1b2   :  { %v4816_v27 = vpop.f32.mrf.mxu3  ;;  %2112 = vmatpush.bf16.msrb.mxu0 %v3045_v9 }
 0x1b4   :  { %2125 = vmatpush.bf16.msrb.mxu1 %v3109_v49  ;;  %v3409_v49 = vld [vmem:[%s5102_s7 + $0x18] sm:$0xff] }
 0x1b6   :  { %v1612_v57 = vpop.f32.mrf.mxu0  ;;  %2113 = vmatpush.bf16.msrb.mxu0 %v3037_v15 }
 0x1b8   :  { %2126 = vmatpush.bf16.msrb.mxu1 %v3101_v3 }
 0x1ba   :  { %v1703_v48 = vpop.f32.mrf.mxu3  ;;  %2114 = vmatpush.bf16.msrb.mxu0 %v3029_v45 }
 0x1bb   :  { %v3105_v48 = vor.u32 %v3399_v38, %v3104_v37  ;;  %v3412_v37 = vld [vmem:[%s5102_s7 + $0x30] sm:$0xff]  ;;  %v3418_v38 = vld [vmem:[%s5102_s7 + $0x60] sm:$0xff] }
 0x1bc   :  { %2127 = vmatpush.bf16.msrb.mxu1 %v3093_v10  ;;  %v1811_v10 = vld [vmem:[%s5103_s6] sm:$0x3] }
 0x1bd   :  { %2086 = vmatpush.bf16.msra.mxu2 %v3105_v48  ;;  %v3410_v48 = vld [vmem:[%s5102_s7 + $0x20] sm:$0xff] }
 0x1be   :  { %v4872_v53 = vpop.f32.mrf.mxu0  ;;  %2115 = vmatpush.bf16.msrb.mxu0 %v3021_v61  ;;  %v918_v61 = vperm.slane %v4701_v20, 2  ;;  %v3421_v20 = vld [vmem:[%s5102_s7 + $0x78] sm:$0xff] }
 0x1bf   :  { %v1663_v45 = vadd.f32 %v4872_v53, %v4752_v50  ;;  %2284 = vmatpush.bf16.msrb.mxu3 %v3421_v20 }
 0x1c0   :  { %2128 = vmatpush.bf16.msrb.mxu1 %v3085_v44  ;;  %v1702_v62 = vadd.f32 %v4816_v27, %v918_v61  ;;  %v3420_v27 = vld [vmem:[%s5102_s7 + $0x70] sm:$0xff] }
 0x1c1   :  { %2087 = vmatpush.bf16.msra.mxu2 %v3097_v1 }
 0x1c2   :  { %2116 = vmatpush.bf16.msrb.mxu0 %v3013_v36  ;;  %v3419_v36 = vld [vmem:[%s5102_s7 + $0x68] sm:$0xff] }
 0x1c3   :  { %2285 = vmatpush.bf16.msrb.mxu3 %v3420_v27 }
 0x1c4   :  { %2129 = vmatpush.bf16.msrb.mxu1 %v3077_v25  ;;  %v3422_v25 = vld [vmem:[%s5104_s8] ss:$0 sm:$0xff] }
 0x1c5   :  { %2088 = vmatpush.bf16.msra.mxu2 %v3089_v7 }
 0x1c6   :  { %v1664_v12 = vpop.f32.mrf.mxu0 }
 0x1c7   :  { %v3393_v12 = vld [vmem:[%s5101_s5 + $0x114] sm:$0xf0]  ;;  %2286 = vmatpush.bf16.msrb.mxu3 %v3419_v36 }
 0x1c8   :  { %v3081_v13 = vor.u32 %v3393_v12, %v3080_v31  ;;  %v1813_v12 = vperm.slane %v1811_v10, 0 }
 0x1ca   :  { %2089 = vmatpush.bf16.msra.mxu2 %v3081_v13 }
 0x1cb   :  { %2287 = vmatpush.bf16.msrb.mxu3 %v3418_v38 }
 0x1ce   :  { %v4943_v57 = vpop.f32.mrf.mxu0  ;;  %2090 = vmatpush.bf16.msra.mxu2 %v3073_v22 }
 0x1cf   :  { %v1715_v63 = vadd.f32 %v4943_v57, %v1702_v62  ;;  %v3413_v57 = vld [vmem:[%s5102_s7 + $0x38] sm:$0xff] }
 0x1d2   :  { %2271 = vmatpush.bf16.msrb.mxu2 %v3413_v57 }
 0x1d6   :  { %v1716_v41 = vpop.f32.mrf.mxu0  ;;  %2272 = vmatpush.bf16.msrb.mxu2 %v3412_v37 }
 0x1d7   :  { %v3417_v41 = vld [vmem:[%s5102_s7 + $0x58] sm:$0xff] }
 0x1d8   :  { %2288 = vmatpush.bf16.msrb.mxu3 %v3417_v41 }
 0x1da   :  { %2273 = vmatpush.bf16.msrb.mxu2 %v3411_v40 }
 0x1dc   :  { %2289 = vmatpush.bf16.msrb.mxu3 %v3416_v42 }
 0x1de   :  { %2274 = vmatpush.bf16.msrb.mxu2 %v3410_v48 }
 0x1e0   :  { %2290 = vmatpush.bf16.msrb.mxu3 %v3415_v55 }
 0x1e2   :  { %2275 = vmatpush.bf16.msrb.mxu2 %v3409_v49 }
 0x1e4   :  { %v1623_v9 = vpop.f32.mrf.mxu1  ;;  %2291 = vmatpush.bf16.msrb.mxu3 %v3414_v2 }
 0x1e5   :  { %v1624_v11 = vadd.f32 %v1623_v9, %v1611_v52 }
 0x1e6   :  { %2276 = vmatpush.bf16.msrb.mxu2 %v3408_v0 }
 0x1e7   :  { %v1757_v5 = vmax.f32 %v1624_v11, 0.0  ;;  %v1814_v11 = vperm.slane %v1811_v10, 1 }
 0x1e9   :  { %v1760_v15 = vpack.c.bf16 %v1757_v5, %v1757_v5 }
 0x1ea   :  { %v1688_v16 = vpop.f32.mrf.mxu2  ;;  %2277 = vmatpush.bf16.msrb.mxu2 %v3407_v43 }
 0x1eb   :  { %v1753_v21 = vpop.f32.mrf.mxu3  ;;  %2065 = vmatmul.bf16.vlgmr.msra.gmra.mxu0 %v1760_v15  ;;  %2104 = vmatmul.bf16.vlgmr.msra.gmra.mxu3 %v1760_v15 }
 0x1ec   :  { %v1625_v24 = vpop.f32.mrf.mxu1 }
 0x1ee   :  { %2278 = vmatpush.bf16.msrb.mxu2 %v3406_v6 }
 0x1f2   :  { %v1690_v28 = vpop.f32.mrf.mxu2 }
 0x1f3   :  { %v1755_v32 = vpop.f32.mrf.mxu3 }
 0x1f4   :  { %v1675_v56 = vpop.f32.mrf.mxu1 }
 0x1f5   :  { %v1676_v26 = vadd.f32 %v1675_v56, %v1663_v45 }
 0x1f7   :  { %v1689_v58 = vadd.f32 %v1688_v16, %v1676_v26 }
 0x1f9   :  { %v1758_v59 = vmax.f32 %v1689_v58, 0.0 }
 0x1fa   :  { %v1740_v60 = vpop.f32.mrf.mxu2 }
 0x1fb   :  { %v1761_v29 = vpack.c.bf16 %v1758_v59, %v1758_v59 }
 0x1fc   :  { %v1677_v35 = vpop.f32.mrf.mxu1 }
 0x1fd   :  { %2078 = vmatmul.bf16.vlgmr.msra.gmra.mxu1 %v1761_v29  ;;  %2117 = vmatmul.bf16.vlgmr.msrb.gmra.mxu0 %v1761_v29 }
 0x202   :  { %v1742_v46 = vpop.f32.mrf.mxu2 }
 0x204   :  { %v1727_v30 = vpop.f32.mrf.mxu1 }
 0x205   :  { %v1728_v51 = vadd.f32 %v1727_v30, %v1715_v63 }
 0x207   :  { %v1741_v50 = vadd.f32 %v1740_v60, %v1728_v51 }
 0x209   :  { %v1754_v53 = vadd.f32 %v1753_v21, %v1741_v50 }
 0x20b   :  { %v1759_v33 = vmax.f32 %v1754_v53, 0.0 }
 0x20c   :  { %v1729_v34 = vpop.f32.mrf.mxu1 }
 0x20d   :  { %v1762_v47 = vpack.c.bf16 %v1759_v33, %v1759_v33 }
 0x20f   :  { %2091 = vmatmul.bf16.vlgmr.msra.gmra.mxu2 %v1762_v47  ;;  %2130 = vmatmul.bf16.vlgmr.msrb.gmra.mxu1 %v1762_v47 }
 0x268   :  { %v2066_v54 = vpop.f32.mrf.mxu0 }
 0x269   :  { %v2067_v14 = vadd.f32 %v2066_v54, %v1813_v12 }
 0x26e   :  { %v2105_v1 = vpop.f32.mrf.mxu3 }
 0x26f   :  { %v2106_v31 = vadd.f32 %v2105_v1, %v1814_v11 }
 0x270   :  { %v2068_v3 = vpop.f32.mrf.mxu0 }
 0x276   :  { %v2107_v4 = vpop.f32.mrf.mxu3 }
 0x27a   :  { %v2079_v52 = vpop.f32.mrf.mxu1  ;;  %v2118_v7 = vpop.f32.mrf.mxu0 }
 0x27b   :  { %v2119_v39 = vadd.f32 %v2118_v7, %v2106_v31  ;;  %v2080_v15 = vadd.f32 %v2079_v52, %v2067_v14 }
 0x282   :  { %v2081_v8 = vpop.f32.mrf.mxu1  ;;  %v2120_v9 = vpop.f32.mrf.mxu0 }
 0x28c   :  { %v2131_v5 = vpop.f32.mrf.mxu1 }
 0x28d   :  { %v2132_v13 = vadd.f32 %v2131_v5, %v2119_v39 }
 0x28f   :  { %v2136_v44 = vmax.f32 %v2132_v13, 0.0 }
 0x291   :  { %v2138_v16 = vpack.c.bf16 %v2136_v44, %v2136_v44 }
 0x292   :  { %v2092_v17 = vpop.f32.mrf.mxu2 }
 0x293   :  { %v2093_v18 = vadd.f32 %v2092_v17, %v2080_v15  ;;  %2292 = vmatmul.bf16.vlgmr.msrb.gmra.mxu3 %v2138_v16 }
 0x294   :  { %v2133_v19 = vpop.f32.mrf.mxu1 }
 0x295   :  { %v2135_v21 = vmax.f32 %v2093_v18, 0.0 }
 0x297   :  { %v2137_v22 = vpack.c.bf16 %v2135_v21, %v2135_v21 }
 0x299   :  { %2279 = vmatmul.bf16.vlgmr.msrb.gmra.mxu2 %v2137_v22 }
 0x29a   :  { %v2094_v23 = vpop.f32.mrf.mxu2 }
 0x316   :  { %v2293_v24 = vpop.f32.mrf.mxu3 }
 0x31c   :  { %v2280_v28 = vpop.f32.mrf.mxu2 }
 0x31d   :  { %v2281_v45 = vadd.f32 %v3422_v25, %v2280_v28 }
 0x31e   :  { %v2295_v32 = vpop.f32.mrf.mxu3 }
 0x31f   :  { %v2294_v56 = vadd.f32 %v2293_v24, %v2281_v45 }
 0x321   :  { %2297 = vst [vmem:[%s5105_s9] sm:$0xff] %v2294_v56 }
 0x324   :  { %v2282_v26 = vpop.f32.mrf.mxu2 }

</bundles_post_ra>
